<compile_context>
chip_gen: v7x
topology: tpu7x:2x2x1
jax: 0.10.0
libtpu: 0.0.40
codegen_flags: <defaults>
</compile_context>

<pallas_src>
import math

import jax
import jax.numpy as jnp
from jax.experimental import pallas as pl
from jax.experimental.pallas import tpu as pltpu


# ----------------------------- helpers ---------------------------------------
def _round_up(x, m):
    return (x + m - 1) // m * m


# ----------------------------- kernel -----------------------------------------
def _make_mlp_kernel(num_layers, sigmoid_output):
    """Fused kernel: (x tile) -> L linear layers (+ReLU between) -> optional sigmoid."""

    def kernel(x_ref, *refs):
        o_ref = refs[-1]                      # (TM, d_out_pad) f32 output tile
        h = x_ref[...]                        # (TM, d_in)      bf16 activation tile
        for l in range(num_layers):           # static unroll over layers
            w = refs[2 * l][...]              # (d_in_l, d_out_l) bf16 weight (resident)
            b = refs[2 * l + 1][...]          # (1, d_out_l)      f32 bias   (resident)
            # bf16 MXU operands, f32 accumulation; bias add / ReLU stay f32.
            y = jnp.dot(h.astype(jnp.bfloat16), w,
                        preferred_element_type=jnp.float32) + b
            h = jnp.maximum(y, 0.0) if l < num_layers - 1 else y
        if sigmoid_output:
            h = jax.nn.sigmoid(h)             # EUP path, f32
        o_ref[...] = h.astype(o_ref.dtype)

    return kernel


# ----------------------------- wrapper -----------------------------------------
def mlp_pallas(params, x, *, sigmoid_output=False, max_block_rows=512):
    """params: list of (w, b) with w: (d_in, d_out) bf16, b: (1, d_out) f32.
    x: (..., d_in) float. Returns (..., d_out) f32."""
    num_layers = len(params)
    d_in = x.shape[-1]
    d_out = params[-1][0].shape[1]
    lead = x.shape[:-1]
    rows = math.prod(lead) if lead else 1

    # bf16 activations on the wire: halves the x HBM read; the kernel casts to
    # bf16 before every jnp.dot anyway, so layer-1 math is unchanged.
    xm = x.reshape(rows, d_in).astype(jnp.bfloat16)

    # Lane-dense final output: zero-pad the last layer's weight/bias to a
    # multiple of 128 output lanes (unmasked vst); slice the result outside.
    d_out_pad = max(_round_up(d_out, 128), 128)
    params = list(params)
    if d_out_pad != d_out:
        w_l, b_l = params[-1]
        w_l = jnp.pad(w_l, ((0, 0), (0, d_out_pad - d_out)))
        b_l = jnp.pad(b_l, ((0, 0), (0, d_out_pad - d_out)))
        params[-1] = (w_l, b_l)

    # Row tile: large tiles (grid-step overhead dominates at these sizes), but
    # keep grid >= 2 when there is enough work so both v7x TensorCores get a
    # tile via the "parallel" dimension semantics.
    rows8 = _round_up(rows, 8)
    if rows8 <= 8:
        tm = rows8                                        # tiny input: one tile
    else:
        tm = min(max_block_rows, _round_up((rows8 + 1) // 2, 8))
    padded = _round_up(rows, tm)
    if padded != rows:
        xm = jnp.pad(xm, ((0, padded - rows), (0, 0)))
    grid = (padded // tm,)

    resident = pl.Buffered(1)     # grid-invariant blocks: single-buffer (half VMEM)
    in_specs = [pl.BlockSpec((tm, d_in), lambda i: (i, 0))]
    flat_params = []
    for w, b in params:
        in_specs.append(pl.BlockSpec(w.shape, lambda i: (0, 0),
                                     pipeline_mode=resident))   # weights resident
        in_specs.append(pl.BlockSpec(b.shape, lambda i: (0, 0),
                                     pipeline_mode=resident))   # bias resident
        flat_params.extend([w, b])

    out = pl.pallas_call(
        _make_mlp_kernel(num_layers, sigmoid_output),
        grid=grid,
        in_specs=in_specs,
        out_specs=pl.BlockSpec((tm, d_out_pad), lambda i: (i, 0)),
        out_shape=jax.ShapeDtypeStruct((padded, d_out_pad), jnp.float32),
        compiler_params=pltpu.CompilerParams(
            dimension_semantics=("parallel",)),   # megacore-shard row tiles on v7x
    )(xm, *flat_params)

    return out[:rows, :d_out].reshape(*lead, d_out)


# ----------------------------- reference (same precision policy) ---------------
def mlp_ref(params, x, *, sigmoid_output=False):
    h = x.astype(jnp.float32)
    n = len(params)
    for l, (w, b) in enumerate(params):
        y = jnp.dot(h.astype(jnp.bfloat16), w,
                    preferred_element_type=jnp.float32) + b
        h = jnp.maximum(y, 0.0) if l < n - 1 else y
    if sigmoid_output:
        h = jax.nn.sigmoid(h)
    return h


# ----------------------------- parameters --------------------------------------
def init_mlp_params(key, input_dim, hidden_dim, output_dim, num_layers):
    """Matches torch.nn.Linear default init; weights stored transposed (in, out)
    and cast to bf16 (halves weight DMA; matmul accumulates in f32)."""
    dims = [input_dim] + [hidden_dim] * (num_layers - 1) + [output_dim]
    keys = jax.random.split(key, num_layers)
    params = []
    for l in range(num_layers):
        kw, kb = jax.random.split(keys[l])
        fan_in, fan_out = dims[l], dims[l + 1]
        bound = 1.0 / math.sqrt(fan_in)
        w = jax.random.uniform(kw, (fan_in, fan_out), jnp.float32, -bound, bound)
        b = jax.random.uniform(kb, (1, fan_out), jnp.float32, -bound, bound)
        params.append((w.astype(jnp.bfloat16), b))
    return params


# ----------------------------- main ---------------------------------------------
if __name__ == "__main__":
    key = jax.random.PRNGKey(0)
    k1, k2, k3, k4 = jax.random.split(key, 4)

    # Config 1: SAM-style hypernetwork MLP: 256 -> 256 -> 256 -> 128, 3 layers,
    # no sigmoid.  x: (batch=2, tokens=256, input_dim=256) -> two 256-row tiles.
    p1 = init_mlp_params(k1, input_dim=256, hidden_dim=256, output_dim=128,
                         num_layers=3)
    x1 = jax.random.normal(k2, (2, 256, 256), jnp.float32)
    y1 = jax.block_until_ready(mlp_pallas(p1, x1, sigmoid_output=False))
    r1 = mlp_ref(p1, x1, sigmoid_output=False)
    assert y1.shape == (2, 256, 128), y1.shape
    assert bool(jnp.isfinite(y1).all())
    assert bool(jnp.allclose(y1, r1, rtol=5e-3, atol=5e-3)), \
        float(jnp.max(jnp.abs(y1 - r1)))

    # Config 2: small IoU-head-style MLP with sigmoid_output=True, ragged rows
    # (5 rows -> one 8-row tile) and d_out=32 (lane-padded to 128 internally).
    p2 = init_mlp_params(k3, input_dim=256, hidden_dim=256, output_dim=32,
                         num_layers=2)
    x2 = jax.random.normal(k4, (5, 256), jnp.float32)
    y2 = jax.block_until_ready(mlp_pallas(p2, x2, sigmoid_output=True))
    r2 = mlp_ref(p2, x2, sigmoid_output=True)
    assert y2.shape == (5, 32), y2.shape
    assert bool(jnp.isfinite(y2).all())
    assert bool(jnp.allclose(y2, r2, rtol=5e-3, atol=5e-3)), \
        float(jnp.max(jnp.abs(y2 - r2)))

    print("KERNEL_OK")
</pallas_src>

<mosaic_0001>
module attributes {stable_mosaic.version = 11 : i64} {
  func.func @kernel(%arg0: i32, %arg1: memref<256x256xbf16, #tpu.memory_space<vmem>>, %arg2: memref<256x256xbf16, #tpu.memory_space<vmem>>, %arg3: memref<1x256xf32, #tpu.memory_space<vmem>>, %arg4: memref<256x256xbf16, #tpu.memory_space<vmem>>, %arg5: memref<1x256xf32, #tpu.memory_space<vmem>>, %arg6: memref<256x128xbf16, #tpu.memory_space<vmem>>, %arg7: memref<1x128xf32, #tpu.memory_space<vmem>>, %arg8: memref<256x128xf32, #tpu.memory_space<vmem>>) attributes {dimension_semantics = [#tpu.dimension_semantics<parallel>], iteration_bounds = array<i64: 2>, scalar_prefetch = 0 : i64, scratch_operands = 0 : i64, tpu.core_type = #tpu.core_type<tc>, window_params = [{transform_indices = @transform_0, window_bounds = array<i64: 256, 256>}, {pipeline_mode = #tpu.pipeline_mode<synchronous>, transform_indices = @transform_1, window_bounds = array<i64: 256, 256>}, {pipeline_mode = #tpu.pipeline_mode<synchronous>, transform_indices = @transform_2, window_bounds = array<i64: 1, 256>}, {pipeline_mode = #tpu.pipeline_mode<synchronous>, transform_indices = @transform_3, window_bounds = array<i64: 256, 256>}, {pipeline_mode = #tpu.pipeline_mode<synchronous>, transform_indices = @transform_4, window_bounds = array<i64: 1, 256>}, {pipeline_mode = #tpu.pipeline_mode<synchronous>, transform_indices = @transform_5, window_bounds = array<i64: 256, 128>}, {pipeline_mode = #tpu.pipeline_mode<synchronous>, transform_indices = @transform_6, window_bounds = array<i64: 1, 128>}, {transform_indices = @transform_7, window_bounds = array<i64: 256, 128>}]} {
    %c0 = arith.constant 0 : index
    %c0_0 = arith.constant 0 : index
    %0 = vector.load %arg1[%c0, %c0_0] : memref<256x256xbf16, #tpu.memory_space<vmem>>, vector<256x256xbf16>
    %c0_1 = arith.constant 0 : index
    %c0_2 = arith.constant 0 : index
    %1 = vector.load %arg2[%c0_1, %c0_2] : memref<256x256xbf16, #tpu.memory_space<vmem>>, vector<256x256xbf16>
    %c0_3 = arith.constant 0 : index
    %c0_4 = arith.constant 0 : index
    %2 = vector.load %arg3[%c0_3, %c0_4] : memref<1x256xf32, #tpu.memory_space<vmem>>, vector<1x256xf32>
    %cst = arith.constant dense<0.000000e+00> : vector<256x256xf32>
    %3 = tpu.matmul %0, %1, %cst {dimension_numbers = #tpu.dot_dimension_numbers<[1], [0], [0], [1], [0, 0, 1, 1], [], []>} : vector<256x256xbf16>, vector<256x256xbf16>, vector<256x256xf32> -> vector<256x256xf32>
    %4 = vector.broadcast %2 : vector<1x256xf32> to vector<256x256xf32>
    %5 = arith.addf %3, %4 : vector<256x256xf32>
    %cst_5 = arith.constant 0.000000e+00 : f32
    %6 = vector.broadcast %cst_5 : f32 to vector<256x256xf32>
    %7 = arith.maximumf %5, %6 : vector<256x256xf32>
    %c0_6 = arith.constant 0 : index
    %c0_7 = arith.constant 0 : index
    %8 = vector.load %arg4[%c0_6, %c0_7] : memref<256x256xbf16, #tpu.memory_space<vmem>>, vector<256x256xbf16>
    %c0_8 = arith.constant 0 : index
    %c0_9 = arith.constant 0 : index
    %9 = vector.load %arg5[%c0_8, %c0_9] : memref<1x256xf32, #tpu.memory_space<vmem>>, vector<1x256xf32>
    %10 = arith.truncf %7 : vector<256x256xf32> to vector<256x256xbf16>
    %cst_10 = arith.constant dense<0.000000e+00> : vector<256x256xf32>
    %11 = tpu.matmul %10, %8, %cst_10 {dimension_numbers = #tpu.dot_dimension_numbers<[1], [0], [0], [1], [0, 0, 1, 1], [], []>} : vector<256x256xbf16>, vector<256x256xbf16>, vector<256x256xf32> -> vector<256x256xf32>
    %12 = vector.broadcast %9 : vector<1x256xf32> to vector<256x256xf32>
    %13 = arith.addf %11, %12 : vector<256x256xf32>
    %cst_11 = arith.constant 0.000000e+00 : f32
    %14 = vector.broadcast %cst_11 : f32 to vector<256x256xf32>
    %15 = arith.maximumf %13, %14 : vector<256x256xf32>
    %c0_12 = arith.constant 0 : index
    %c0_13 = arith.constant 0 : index
    %16 = vector.load %arg6[%c0_12, %c0_13] : memref<256x128xbf16, #tpu.memory_space<vmem>>, vector<256x128xbf16>
    %c0_14 = arith.constant 0 : index
    %c0_15 = arith.constant 0 : index
    %17 = vector.load %arg7[%c0_14, %c0_15] : memref<1x128xf32, #tpu.memory_space<vmem>>, vector<1x128xf32>
    %18 = arith.truncf %15 : vector<256x256xf32> to vector<256x256xbf16>
    %cst_16 = arith.constant dense<0.000000e+00> : vector<256x128xf32>
    %19 = tpu.matmul %18, %16, %cst_16 {dimension_numbers = #tpu.dot_dimension_numbers<[1], [0], [0], [1], [0, 0, 1, 1], [], []>} : vector<256x256xbf16>, vector<256x128xbf16>, vector<256x128xf32> -> vector<256x128xf32>
    %20 = vector.broadcast %17 : vector<1x128xf32> to vector<256x128xf32>
    %21 = arith.addf %19, %20 : vector<256x128xf32>
    %c0_17 = arith.constant 0 : index
    %c0_18 = arith.constant 0 : index
    %22 = vector.load %arg8[%c0_17, %c0_18] : memref<256x128xf32, #tpu.memory_space<vmem>>, vector<256x128xf32>
    tpu.vector_store %arg8[%c0_17, %c0_18], %21 {strides = array<i32>} : memref<256x128xf32, #tpu.memory_space<vmem>>, vector<256x128xf32>,
    return
  }
  func.func @transform_0(%arg0: i32) -> (i32, i32) {
    %c0_i32 = arith.constant 0 : i32
    %c0_i32_0 = arith.constant 0 : i32
    return %arg0, %c0_i32 : i32, i32
  }
  func.func @transform_1(%arg0: i32) -> (i32, i32) {
    %c0_i32 = arith.constant 0 : i32
    %c0_i32_0 = arith.constant 0 : i32
    %c0_i32_1 = arith.constant 0 : i32
    return %c0_i32, %c0_i32_0 : i32, i32
  }
  func.func @transform_2(%arg0: i32) -> (i32, i32) {
    %c0_i32 = arith.constant 0 : i32
    %c0_i32_0 = arith.constant 0 : i32
    %c0_i32_1 = arith.constant 0 : i32
    return %c0_i32, %c0_i32_0 : i32, i32
  }
  func.func @transform_3(%arg0: i32) -> (i32, i32) {
    %c0_i32 = arith.constant 0 : i32
    %c0_i32_0 = arith.constant 0 : i32
    %c0_i32_1 = arith.constant 0 : i32
    return %c0_i32, %c0_i32_0 : i32, i32
  }
  func.func @transform_4(%arg0: i32) -> (i32, i32) {
    %c0_i32 = arith.constant 0 : i32
    %c0_i32_0 = arith.constant 0 : i32
    %c0_i32_1 = arith.constant 0 : i32
    return %c0_i32, %c0_i32_0 : i32, i32
  }
  func.func @transform_5(%arg0: i32) -> (i32, i32) {
    %c0_i32 = arith.constant 0 : i32
    %c0_i32_0 = arith.constant 0 : i32
    %c0_i32_1 = arith.constant 0 : i32
    return %c0_i32, %c0_i32_0 : i32, i32
  }
  func.func @transform_6(%arg0: i32) -> (i32, i32) {
    %c0_i32 = arith.constant 0 : i32
    %c0_i32_0 = arith.constant 0 : i32
    %c0_i32_1 = arith.constant 0 : i32
    return %c0_i32, %c0_i32_0 : i32, i32
  }
  func.func @transform_7(%arg0: i32) -> (i32, i32) {
    %c0_i32 = arith.constant 0 : i32
    %c0_i32_0 = arith.constant 0 : i32
    return %arg0, %c0_i32 : i32, i32
  }
}

</mosaic_0001>

<bundles_post_ra>
// kernel: tpu_custom_call.1
= control target key start
LH: loop header
LB: loop body
LE: loop exit
PB: predicated region body
PF: predicated region fallthrough
CT: control target
= control target key end

     0   :  { %12 = vsyncpa [#allocation3], 0  ;;  %s3300_s0 = inlined_call_operand.hbm [shape: bf16[512,256], index: 0, kind: input, shape index: {}]   ;;  %s3301_s1 = inlined_call_operand.hbm [shape: bf16[256,256], index: 1, kind: input, shape index: {}]   ;;  %s3302_s2 = inlined_call_operand.vmem [shape: f32[1,256], index: 2, kind: input, shape index: {}]   ;;  %s3303_s3 = inlined_call_operand.hbm [shape: bf16[256,256], index: 3, kind: input, shape index: {}]   ;;  %s3304_s4 = inlined_call_operand.vmem [shape: f32[1,256], index: 4, kind: input, shape index: {}]   ;;  %s3305_s5 = inlined_call_operand.hbm [shape: bf16[256,128], index: 5, kind: input, shape index: {}]   ;;  %s3306_s6 = inlined_call_operand.vmem [shape: f32[1,128], index: 6, kind: input, shape index: {}]   ;;  %s3307_s7 = inlined_call_operand.hbm [shape: f32[512,128], index: 7, kind: output, shape index: {}]  }
   0x1   :  { %14 = vsyncpa [#allocation3 + $0x1], 0 }
   0x2   :  { %15 = vsyncpa [#allocation6], 0 }
   0x3   :  { %16 = vsyncpa [#allocation9], 0 }
   0x4   :  { %17 = vsyncpa [#allocation4], 0 }
   0x5   :  { %19 = vsyncpa [#allocation4 + $0x1], 0  ;;  %s2732_s24 = smov 0   ;;  %s2734_s25 = smov 0  }
   0x6   :  { %s2736_s26 = smov 0   ;;  %s2738_s27 = smov 0  }
   0x7 LB: > { %s2753_s28 = sadd.s32 4294967295, %s2679_s27   ;;  %s1967_s29 = sadd.s32 4294967294, %s2679_s27   ;;  %s2679_s27 = sphi %s2738_s27, %s3333_s27   ;;  %s2675_s26 = sphi %s2736_s26, %s3332_s26   ;;  %s2671_s25 = sphi %s2734_s25, %s3331_s25   ;;  %s2667_s24 = sphi %s2732_s24, %s3330_s24  }
   0x8   : > { %p45_p0 = scmp.ne.s32.totalorder %s2671_s25, %s2667_s24  ;;  %p3308_p1 = scmp.eq.s32.totalorder %s2753_s28, 0 }
   0x9   : > { %p201_p3 = scmp.eq.s32.totalorder %s1967_s29, 1  ;;  %p1968_p5 = scmp.ge.s32.totalorder %s2679_s27, 1 }
   0xa   : > { %p2762_p4 = por %p3308_p1, %p45_p0  ;;  %p208_p7 = scmp.lt.s32.totalorder %s2679_s27, 3 }
   0xb   : > { %p2767_p6 = por %p201_p3, %p45_p0  ;;  %s2681_s10 = smov [#allocation5]  }
   0xc   : > { %s3312_s30 = scalar_select %p2762_p4, 1, 0 }
   0xd   : > { %s3313_s8 = scalar_select %p2767_p6, 1, 0 }
   0xe   : > { %p2772_p8 = pnand %p1968_p5, %p208_p7  ;;  %s220_s11 = sshll.u32 %s2681_s10, 4  ;;  %s2776_s11 = int_to_ptr.vmem [resolvable:$true] %s220_s11 }
   0xf   : > { %3314 = sst [smem:[#allocation15_spill]] %s3313_s8  ;;  %s2682_s13 = smov [#allocation7]  }
  0x10   : > { %s3315_s9 = scalar_select %p2772_p8, 1, 0 }
  0x11   : > { %p2264_p9 = pneg %p2772_p8  ;;  %s236_s14 = sshll.u32 %s2682_s13, 4  ;;  %s2787_s14 = int_to_ptr.vmem [resolvable:$true] %s236_s14 }
  0x12   : > { %s2683_s15 = smov [#allocation8]   ;;  %s2491_s19 = scalar_lea.hbm %s3301_s1, 4096 }
  0x13   : > { %p2783_p11 = pnand %p2264_p9, %p3308_p1  ;;  %s2789_s16 = sshll.u32 %s2683_s15, 4  ;;  %s253_s16 = int_to_ptr.vmem [resolvable:$true] %s2789_s16 }
  0x14   : > { %p2492_p12 = scmp.ne.s32.totalorder %s3301_s1, %s2491_s19  ;;  %p2498_p5 = scmp.lt.u32.totalorder %s2491_s19, %s3301_s1 }
  0x15   : > { %p2799_p13 = pneg %p2783_p11 }
  0x17   : > { %p2494_p0 = pnand %p2799_p13, %p2492_p12 }
  0x19   : > { %p2495_p3 = pneg %p2494_p0 }
  0x1b   : > { %p2500_p7 = pnand %p2498_p5, %p2495_p3 }
  0x1d   : > { %2503 = shalt.err (!%p2500_p7)
}
  0x1e   : > { %s2504_s10 = scalar_lea.vmem %s2776_s11, 4096  ;;  %p2512_p2 = scmp.lt.s32.totalorder %s2776_s11, %s2776_s11 }
  0x1f   : > { %p2505_p9 = scmp.ne.s32.totalorder %s2776_s11, %s2504_s10  ;;  %p2513_p6 = scmp.lt.s32.totalorder %s2504_s10, %s2504_s10 }
  0x21   : > { %p2507_p10 = pnand %p2505_p9, %p2799_p13  ;;  %p2514_p12 = por %p2513_p6, %p2512_p2 }
  0x23   : > { %p2508_p1 = pneg %p2507_p10 }
  0x25   : > { %p2515_p0 = pnand %p2514_p12, %p2508_p1 }
  0x27   : > { %2518 = shalt.err (!%p2515_p0)
}
  0x28   : > { %s2684_s13 = smov 128   ;;  %s2685_s15 = smov 8  }
  0x29   : > { %2267 = dma.hbm_to_vmem [thread:$0]  (!%p2783_p11), %s3301_s1, 4096, %s2776_s11, [#allocation6], %s2684_s13, %s2684_s13, %s2685_s15  }
  0x2a   : > { %s2519_s21 = scalar_lea.hbm %s3303_s3, 4096 }
  0x2b   : > { %p2520_p1 = scmp.ne.s32.totalorder %s3303_s3, %s2519_s21  ;;  %p2526_p10 = scmp.lt.u32.totalorder %s2519_s21, %s3303_s3 }
  0x2d   : > { %p2522_p2 = pnand %p2520_p1, %p2799_p13 }
  0x2f   : > { %p2523_p6 = pneg %p2522_p2 }
  0x31   : > { %p2528_p3 = pnand %p2526_p10, %p2523_p6 }
  0x33   : > { %2531 = shalt.err (!%p2528_p3)
}
  0x34   : > { %s2532_s11 = scalar_lea.vmem %s2787_s14, 4096  ;;  %p2540_p12 = scmp.lt.s32.totalorder %s2787_s14, %s2787_s14 }
  0x35   : > { %p2533_p5 = scmp.ne.s32.totalorder %s2787_s14, %s2532_s11  ;;  %p2541_p0 = scmp.lt.s32.totalorder %s2532_s11, %s2532_s11 }
  0x37   : > { %p2535_p7 = pnand %p2533_p5, %p2799_p13  ;;  %p2542_p1 = por %p2541_p0, %p2540_p12 }
  0x39   : > { %p2536_p9 = pneg %p2535_p7 }
  0x3b   : > { %p2543_p2 = pnand %p2542_p1, %p2536_p9 }
  0x3d   : > { %2546 = shalt.err (!%p2543_p2)
}
  0x3e   : > { %2270 = dma.hbm_to_vmem [thread:$0]  (!%p2783_p11), %s3303_s3, 4096, %s2787_s14, [#allocation6], %s2684_s13, %s2684_s13, %s2685_s15  }
  0x3f   : > { %s2547_s20 = scalar_lea.hbm %s3305_s5, 2048 }
  0x40   : > { %p2548_p6 = scmp.ne.s32.totalorder %s3305_s5, %s2547_s20  ;;  %p2554_p5 = scmp.lt.u32.totalorder %s2547_s20, %s3305_s5 }
  0x42   : > { %p2550_p10 = pnand %p2548_p6, %p2799_p13 }
  0x44   : > { %p2551_p3 = pneg %p2550_p10 }
  0x46   : > { %p2556_p7 = pnand %p2554_p5, %p2551_p3 }
  0x48   : > { %2559 = shalt.err (!%p2556_p7)
}
  0x49   : > { %s2560_s11 = scalar_lea.vmem %s253_s16, 2048  ;;  %p2568_p1 = scmp.lt.s32.totalorder %s253_s16, %s253_s16 }
  0x4a   : > { %p2561_p9 = scmp.ne.s32.totalorder %s253_s16, %s2560_s11  ;;  %p2569_p2 = scmp.lt.s32.totalorder %s2560_s11, %s2560_s11 }
  0x4c   : > { %p2563_p12 = pnand %p2561_p9, %p2799_p13  ;;  %p2570_p4 = por %p2569_p2, %p2568_p1 }
  0x4e   : > { %p2564_p0 = pneg %p2563_p12 }
  0x50   : > { %p2571_p8 = pnand %p2570_p4, %p2564_p0 }
  0x52   : > { %2574 = shalt.err (!%p2571_p8)
}
  0x53   : > { %s2686_s14 = smov 64   ;;  %s2687_s22 = smov 4  }
  0x54   : > { %2273 = dma.hbm_to_vmem [thread:$0]  (!%p2783_p11), %s3305_s5, 2048, %s253_s16, [#allocation9], %s2686_s14, %s2686_s14, %s2687_s22  }
  0x55   : > { %s2869_s18 = sadd.s32 1, %s2679_s27   ;;  %s32_s20 = sadd.s32 1, %s2675_s26 }
  0x56   : > { %s29_s19 = ssub.s32 %s2679_s27, %s2869_s18  ;;  %p39_p8 = scmp.ne.s32.totalorder %s2675_s26, %s2671_s25 }
  0x57   : > { %p30_p4 = scmp.eq.s32.totalorder %s29_s19, 0  ;;  %p40_p13 = scmp.eq.s32.totalorder %s2679_s27, 0 }
  0x58   : > { %p2285_p6 = scmp.lt.s32.totalorder %s2679_s27, 2  ;;  %p3318_p3 = scmp.eq.s32.totalorder %s2753_s28, 1 }
  0x59   : > { %s2879_s21 = scalar_select %p30_p4, %s2675_s26, %s32_s20  }
  0x5a   : > { %p41_p10 = por %p40_p13, %p39_p8  ;;  %p2883_p5 = por %p3318_p3, %p39_p8 }
  0x5b   : > { %s269_s12 = sand.u32 1, %s2675_s26   ;;  %s2102_s29 = sshll.u32 %s2679_s27, 12 }
  0x5c   : > { %s1973_s16 = sshll.u32 %s269_s12, 8  ;;  %s2892_s14 = scalar_lea.hbm %s3300_s0, %s2102_s29 }
  0x5d   : > { %s273_s22 = scalar_lea.vmem [#allocation2], %s1973_s16  ;;  %p2894_p11 = pnand %p2285_p6, %p41_p10 }
  0x5e   : > { %s281_s8 = sshll.u32 %s273_s22, 4  ;;  %s2900_s19 = scalar_lea.sflag [#allocation3], %s269_s12  ;;  %s2898_s8 = int_to_ptr.vmem [resolvable:$true] %s281_s8 }
  0x5f   : > { %s2575_s20 = scalar_lea.hbm %s2892_s14, 4096  ;;  %p2577_p9 = pneg %p2894_p11 }
  0x60   : > { %p2576_p7 = scmp.ne.s32.totalorder %s2892_s14, %s2575_s20  ;;  %s2580_s10 = scalar_lea.hbm %s3300_s0, 8192 }
  0x61   : > { %p2581_p1 = scmp.lt.u32.totalorder %s2892_s14, %s3300_s0  ;;  %p2582_p2 = scmp.lt.u32.totalorder %s2580_s10, %s2575_s20 }
  0x62   : > { %p2578_p12 = pnand %p2577_p9, %p2576_p7  ;;  %p2584_p8 = scmp.lt.u32.totalorder %s2575_s20, %s2892_s14 }
  0x63   : > { %p2583_p4 = por %p2582_p2, %p2581_p1 }
  0x64   : > { %p2579_p0 = pneg %p2578_p12 }
  0x65   : > { %p2585_p13 = por %p2584_p8, %p2583_p4 }
  0x67   : > { %p2586_p6 = pnand %p2585_p13, %p2579_p0 }
  0x69   : > { %2589 = shalt.err (!%p2586_p6)
}
  0x6a   : > { %s2590_s12 = scalar_lea.vmem %s2898_s8, 4096  ;;  %s2688_s29 = smov [#allocation2]  }
  0x6b   : > { %p2591_p10 = scmp.ne.s32.totalorder %s2898_s8, %s2590_s12  ;;  %s2595_s16 = sshll.u32 %s2688_s29, 4  ;;  %s2596_s16 = int_to_ptr.vmem [resolvable:$false] %s2595_s16 }
  0x6c   : > { %s2597_s11 = scalar_lea.vmem %s2596_s16, 8192  ;;  %p2598_p12 = scmp.lt.s32.totalorder %s2898_s8, %s2596_s16 }
  0x6d   : > { %p2593_p3 = pnand %p2591_p10, %p2577_p9  ;;  %p2599_p1 = scmp.lt.s32.totalorder %s2597_s11, %s2590_s12 }
  0x6f   : > { %p2594_p7 = pneg %p2593_p3  ;;  %p2600_p2 = por %p2599_p1, %p2598_p12 }
  0x71   : > { %p2601_p4 = pnand %p2600_p2, %p2594_p7 }
  0x73   : > { %2604 = shalt.err (!%p2601_p4)
}
  0x74   : > { %2277 = dma.hbm_to_vmem [thread:$0]  (!%p2894_p11), %s2892_s14, 4096, %s2898_s8, %s2900_s19, %s2684_s13, %s2684_s13, %s2685_s15  }
  0x75   : > { %p3321_p9 = scmp.ne.s32.totalorder %s3315_s9, 0 }
  0x76   : > { %s2934_s20 = sand.u32 (!%p3321_p9), 1, %s2671_s25   ;;  %p3322_p0 = scmp.ne.s32.totalorder (!%p3321_p9), %s3312_s30, 0 }
  0x77   : > { %293 = sbr.rel (%p3321_p9) target bundleno = 997 (0x3e5), region = 48  ;;  %s1978_s10 = sshll.u32 (!%p3321_p9), %s2934_s20, 8 }
  0x78   : > { %s296_s22 = scalar_lea.sflag (!%p3321_p9), [#allocation3], %s2934_s20  ;;  %s2940_s17 = scalar_lea.vmem (!%p3321_p9), [#allocation2], %s1978_s10 }
  0x7e   : > { %2650 = dma.done.wait (%p3322_p0), %s296_s22, 4096  }
  0x7f   : > { %2652 = vsyncadd (%p3322_p0), %s296_s22, 4294963200  ;;  %p3323_p11 = scmp.eq.s32.totalorder %s2753_s28, 0 }
  0x81   : > { %2654 = dma.done.wait (%p3323_p11), [#allocation6], 8192   ;;  %p3324_p8 = pmov %p3323_p11 }
  0x83   : > { %2656 = vsyncadd (%p3324_p8), [#allocation6], 4294959104  ;;  %p3325_p13 = pmov %p3324_p8 }
  0x84   : > { %p3326_p6 = pmov %p3324_p8 }
  0x85   : > { %2658 = dma.done.wait (%p3325_p13), [#allocation9], 2048  }
  0x86   : > { %2660 = vsyncadd (%p3326_p6), [#allocation9], 4294965248  ;;  %v2331_v0 = vld [vmem:[#allocation5 + $0x4] ss:$8 sps:$4 sm:$0xff]   ;;  %v2333_v1 = vld [vmem:[#allocation5] ss:$8 sps:$4 sm:$0xff]  }
  0x87   : > { %741 = vmatprep.subr.bf16.mxu0 %v2331_v0  ;;  %v2334_v2 = vld [vmem:[#allocation5 + $0x14] ss:$8 sps:$4 sm:$0xff]   ;;  %2216 = vmatprep.subr.bf16.mxu1 %v2331_v0  ;;  %v2336_v3 = vld [vmem:[#allocation5 + $0x10] ss:$8 sps:$4 sm:$0xff]   ;;  %v2337_v4 = vld [vmem:[#allocation5 + $0x24] ss:$8 sps:$4 sm:$0xff]  }
  0x88   : > { %742 = vmatpush1.bf16.msra.mxu0 %v2333_v1  ;;  %2232 = vmatpush1.bf16.msra.mxu1 %v2333_v1  ;;  %v2339_v5 = vld [vmem:[#allocation5 + $0x20] ss:$8 sps:$4 sm:$0xff]   ;;  %v2340_v6 = vld [vmem:[#allocation5 + $0x34] ss:$8 sps:$4 sm:$0xff]   ;;  %v2342_v7 = vld [vmem:[#allocation5 + $0x30] ss:$8 sps:$4 sm:$0xff]  }
  0x89   : > { %743 = vmatprep.subr.bf16.mxu0 %v2334_v2  ;;  %2217 = vmatprep.subr.bf16.mxu1 %v2334_v2  ;;  %v2343_v8 = vld [vmem:[#allocation5 + $0x44] ss:$8 sps:$4 sm:$0xff]   ;;  %v2345_v9 = vld [vmem:[#allocation5 + $0x40] ss:$8 sps:$4 sm:$0xff]   ;;  %v2346_v10 = vld [vmem:[#allocation5 + $0x54] ss:$8 sps:$4 sm:$0xff]  }
  0x8a   : > { %v2348_v11 = vld [vmem:[#allocation5 + $0x50] ss:$8 sps:$4 sm:$0xff]   ;;  %v2349_v12 = vld [vmem:[#allocation5 + $0x64] ss:$8 sps:$4 sm:$0xff]   ;;  %v2351_v14 = vld [vmem:[#allocation5 + $0x60] ss:$8 sps:$4 sm:$0xff]  }
  0x8b   : > { %v2381_v13 = vld [vmem:[%s2940_s17 + $0x4] ss:$8 sps:$4 sm:$0xff]   ;;  %v2352_v15 = vld [vmem:[#allocation5 + $0x74] ss:$8 sps:$4 sm:$0xff]   ;;  %v2354_v16 = vld [vmem:[#allocation5 + $0x70] ss:$8 sps:$4 sm:$0xff]  }
  0x8c   : > { %744 = vmatpush1.bf16.msra.mxu0 %v2336_v3  ;;  %2233 = vmatpush1.bf16.msra.mxu1 %v2336_v3  ;;  %v2355_v17 = vld [vmem:[#allocation5 + $0x84] ss:$8 sps:$4 sm:$0xff]   ;;  %v2357_v18 = vld [vmem:[#allocation5 + $0x80] ss:$8 sps:$4 sm:$0xff]   ;;  %v2358_v19 = vld [vmem:[#allocation5 + $0x94] ss:$8 sps:$4 sm:$0xff]  }
  0x8d   : > { %745 = vmatprep.subr.bf16.mxu0 %v2337_v4  ;;  %2218 = vmatprep.subr.bf16.mxu1 %v2337_v4  ;;  %v2405_v20 = vld [vmem:[%s2940_s17 + $0x84] ss:$8 sps:$4 sm:$0xff]   ;;  %v2360_v21 = vld [vmem:[#allocation5 + $0x90] ss:$8 sps:$4 sm:$0xff]   ;;  %v2363_v23 = vld [vmem:[#allocation5 + $0xa0] ss:$8 sps:$4 sm:$0xff]  }
  0x8e   : > { %773 = vmatprep.mubr.bf16.mxu0 %v2381_v13  ;;  %v2361_v22 = vld [vmem:[#allocation5 + $0xa4] ss:$8 sps:$4 sm:$0xff]   ;;  %853 = vmatprep.mubr.bf16.mxu1 %v2405_v20  ;;  %v2364_v24 = vld [vmem:[#allocation5 + $0xb4] ss:$8 sps:$4 sm:$0xff]   ;;  %v2366_v25 = vld [vmem:[#allocation5 + $0xb0] ss:$8 sps:$4 sm:$0xff]  }
  0x8f   : > { %v2367_v26 = vld [vmem:[#allocation5 + $0xc4] ss:$8 sps:$4 sm:$0xff]   ;;  %v2369_v27 = vld [vmem:[#allocation5 + $0xc0] ss:$8 sps:$4 sm:$0xff]   ;;  %v2370_v28 = vld [vmem:[#allocation5 + $0xd4] ss:$8 sps:$4 sm:$0xff]  }
  0x90   : > { %746 = vmatpush1.bf16.msra.mxu0 %v2339_v5  ;;  %2234 = vmatpush1.bf16.msra.mxu1 %v2339_v5  ;;  %v2372_v29 = vld [vmem:[#allocation5 + $0xd0] ss:$8 sps:$4 sm:$0xff]   ;;  %v2373_v30 = vld [vmem:[#allocation5 + $0xe4] ss:$8 sps:$4 sm:$0xff]   ;;  %v2375_v31 = vld [vmem:[#allocation5 + $0xe0] ss:$8 sps:$4 sm:$0xff]  }
  0x91   : > { %747 = vmatprep.subr.bf16.mxu0 %v2340_v6  ;;  %2219 = vmatprep.subr.bf16.mxu1 %v2340_v6  ;;  %v2376_v32 = vld [vmem:[#allocation5 + $0xf4] ss:$8 sps:$4 sm:$0xff]   ;;  %v2378_v33 = vld [vmem:[#allocation5 + $0xf0] ss:$8 sps:$4 sm:$0xff]   ;;  %v2379_v34 = vld [vmem:[%s2940_s17] ss:$8 sps:$4 sm:$0xff]  }
  0x92   : > { %v2429_v35 = vld [vmem:[#allocation7 + $0x4] ss:$8 sps:$4 sm:$0xff]   ;;  %v2382_v36 = vld [vmem:[%s2940_s17 + $0x14] ss:$8 sps:$4 sm:$0xff]   ;;  %v2403_v37 = vld [vmem:[%s2940_s17 + $0x80] ss:$8 sps:$4 sm:$0xff]  }
  0x93   : > { %v2406_v38 = vld [vmem:[%s2940_s17 + $0x94] ss:$8 sps:$4 sm:$0xff]   ;;  %v2427_v39 = vld [vmem:[#allocation7] ss:$8 sps:$4 sm:$0xff]   ;;  %v2430_v41 = vld [vmem:[#allocation7 + $0x10] ss:$8 sps:$4 sm:$0xff]  }
  0x94   : > { %748 = vmatpush1.bf16.msra.mxu0 %v2342_v7  ;;  %2235 = vmatpush1.bf16.msra.mxu1 %v2342_v7  ;;  %v2432_v40 = vld [vmem:[#allocation7 + $0x14] ss:$8 sps:$4 sm:$0xff]   ;;  %v2435_v42 = vld [vmem:[#allocation7 + $0x24] ss:$8 sps:$4 sm:$0xff]   ;;  %v2384_v43 = vld [vmem:[%s2940_s17 + $0x10] ss:$8 sps:$4 sm:$0xff]  }
  0x95   : > { %749 = vmatprep.subr.bf16.mxu0 %v2343_v8  ;;  %2220 = vmatprep.subr.bf16.mxu1 %v2343_v8  ;;  %v2408_v44 = vld [vmem:[%s2940_s17 + $0x90] ss:$8 sps:$4 sm:$0xff]   ;;  %v2385_v45 = vld [vmem:[%s2940_s17 + $0x24] ss:$8 sps:$4 sm:$0xff]   ;;  %v2433_v47 = vld [vmem:[#allocation7 + $0x20] ss:$8 sps:$4 sm:$0xff]  }
  0x96   : > { %v2409_v46 = vld [vmem:[%s2940_s17 + $0xa4] ss:$8 sps:$4 sm:$0xff]   ;;  %v2438_v48 = vld [vmem:[#allocation7 + $0x34] ss:$8 sps:$4 sm:$0xff]   ;;  %v2436_v49 = vld [vmem:[#allocation7 + $0x30] ss:$8 sps:$4 sm:$0xff]  }
  0x97   : > { %v2441_v50 = vld [vmem:[#allocation7 + $0x44] ss:$8 sps:$4 sm:$0xff]   ;;  %v2387_v51 = vld [vmem:[%s2940_s17 + $0x20] ss:$8 sps:$4 sm:$0xff]   ;;  %v2388_v53 = vld [vmem:[%s2940_s17 + $0x34] ss:$8 sps:$4 sm:$0xff]  }
  0x98   : > { %750 = vmatpush1.bf16.msra.mxu0 %v2345_v9  ;;  %2236 = vmatpush1.bf16.msra.mxu1 %v2345_v9  ;;  %v2411_v52 = vld [vmem:[%s2940_s17 + $0xa0] ss:$8 sps:$4 sm:$0xff]   ;;  %v2412_v54 = vld [vmem:[%s2940_s17 + $0xb4] ss:$8 sps:$4 sm:$0xff]   ;;  %v2442_v57 = vld [vmem:[#allocation7 + $0x50] ss:$8 sps:$4 sm:$0xff]  }
  0x99   : > { %751 = vmatprep.subr.bf16.mxu0 %v2346_v10  ;;  %2221 = vmatprep.subr.bf16.mxu1 %v2346_v10  ;;  %v2439_v55 = vld [vmem:[#allocation7 + $0x40] ss:$8 sps:$4 sm:$0xff]   ;;  %v2444_v56 = vld [vmem:[#allocation7 + $0x54] ss:$8 sps:$4 sm:$0xff]   ;;  %v2447_v58 = vld [vmem:[#allocation7 + $0x64] ss:$8 sps:$4 sm:$0xff]  }
  0x9a   : > { %v2390_v59 = vld [vmem:[%s2940_s17 + $0x30] ss:$8 sps:$4 sm:$0xff]   ;;  %v2391_v61 = vld [vmem:[%s2940_s17 + $0x44] ss:$8 sps:$4 sm:$0xff]   ;;  %v2445_v63 = vld [vmem:[#allocation7 + $0x60] ss:$8 sps:$4 sm:$0xff]  }
  0x9b   : > { %v2414_v60 = vld [vmem:[%s2940_s17 + $0xb0] ss:$8 sps:$4 sm:$0xff]   ;;  %v2415_v62 = vld [vmem:[%s2940_s17 + $0xc4] ss:$8 sps:$4 sm:$0xff]   ;;  %v2450_v0 = vld [vmem:[#allocation7 + $0x74] ss:$8 sps:$4 sm:$0xff]  }
  0x9c   : > { %752 = vmatpush1.bf16.msra.mxu0 %v2348_v11  ;;  %2237 = vmatpush1.bf16.msra.mxu1 %v2348_v11  ;;  %v2448_v1 = vld [vmem:[#allocation7 + $0x70] ss:$8 sps:$4 sm:$0xff]   ;;  %v2453_v2 = vld [vmem:[#allocation7 + $0x84] ss:$8 sps:$4 sm:$0xff]   ;;  %v2393_v3 = vld [vmem:[%s2940_s17 + $0x40] ss:$8 sps:$4 sm:$0xff]  }
  0x9d   : > { %753 = vmatprep.subr.bf16.mxu0 %v2349_v12  ;;  %2222 = vmatprep.subr.bf16.mxu1 %v2349_v12  ;;  %v2417_v4 = vld [vmem:[%s2940_s17 + $0xc0] ss:$8 sps:$4 sm:$0xff]   ;;  %v2394_v5 = vld [vmem:[%s2940_s17 + $0x54] ss:$8 sps:$4 sm:$0xff]   ;;  %v2454_v9 = vld [vmem:[#allocation7 + $0x90] ss:$8 sps:$4 sm:$0xff]  }
  0x9e   : > { %v2418_v6 = vld [vmem:[%s2940_s17 + $0xd4] ss:$8 sps:$4 sm:$0xff]   ;;  %v2451_v7 = vld [vmem:[#allocation7 + $0x80] ss:$8 sps:$4 sm:$0xff]   ;;  %v2459_v10 = vld [vmem:[#allocation7 + $0xa4] ss:$8 sps:$4 sm:$0xff]  }
  0x9f   : > { %v2456_v8 = vld [vmem:[#allocation7 + $0x94] ss:$8 sps:$4 sm:$0xff]   ;;  %v2396_v11 = vld [vmem:[%s2940_s17 + $0x50] ss:$8 sps:$4 sm:$0xff]   ;;  %v2397_v13 = vld [vmem:[%s2940_s17 + $0x64] ss:$8 sps:$4 sm:$0xff]  }
  0xa0   : > { %754 = vmatpush1.bf16.msra.mxu0 %v2351_v14  ;;  %2238 = vmatpush1.bf16.msra.mxu1 %v2351_v14  ;;  %v2420_v12 = vld [vmem:[%s2940_s17 + $0xd0] ss:$8 sps:$4 sm:$0xff]   ;;  %v2421_v14 = vld [vmem:[%s2940_s17 + $0xe4] ss:$8 sps:$4 sm:$0xff]   ;;  %v2423_v20 = vld [vmem:[%s2940_s17 + $0xe0] ss:$8 sps:$4 sm:$0xff]  }
  0xa1   : > { %755 = vmatprep.subr.bf16.mxu0 %v2352_v15  ;;  %2223 = vmatprep.subr.bf16.mxu1 %v2352_v15  ;;  %v2457_v15 = vld [vmem:[#allocation7 + $0xa0] ss:$8 sps:$4 sm:$0xff]   ;;  %s3184_s19 = scalar_lea.vmem [#allocation10], %s1978_s10  ;;  %s2103_s12 = sshll.u32 %s2753_s28, 12 }
  0xa2   : > { %s1865_s29 = sshll.u32 %s3184_s19, 4  ;;  %s3251_s10 = scalar_lea.hbm %s3307_s7, %s2103_s12  ;;  %s3253_s29 = int_to_ptr.vmem [resolvable:$true] %s1865_s29 }
  0xa3   : > { %s1852_s28 = scalar_lea.sflag [#allocation4], %s2934_s20  ;;  %s2605_s22 = scalar_lea.vmem %s3253_s29, 4096 }
  0xa4   : > { %756 = vmatpush1.bf16.msra.mxu0 %v2354_v16  ;;  %2239 = vmatpush1.bf16.msra.mxu1 %v2354_v16  ;;  %v2462_v16 = vld [vmem:[#allocation7 + $0xb4] ss:$8 sps:$4 sm:$0xff]   ;;  %p2606_p10 = scmp.ne.s32.totalorder %s3253_s29, %s2605_s22 }
  0xa5   : > { %757 = vmatprep.subr.bf16.mxu0 %v2355_v17  ;;  %2224 = vmatprep.subr.bf16.mxu1 %v2355_v17  ;;  %v2460_v17 = vld [vmem:[#allocation7 + $0xb0] ss:$8 sps:$4 sm:$0xff]  }
  0xa6   : > { %p2607_p3 = pnand %p2606_p10, %p2883_p5 }
  0xa8   : > { %758 = vmatpush1.bf16.msra.mxu0 %v2357_v18  ;;  %2240 = vmatpush1.bf16.msra.mxu1 %v2357_v18  ;;  %v2465_v18 = vld [vmem:[#allocation7 + $0xc4] ss:$8 sps:$4 sm:$0xff]   ;;  %p2608_p7 = pneg %p2607_p3 }
  0xa9   : > { %759 = vmatprep.subr.bf16.mxu0 %v2358_v19  ;;  %2225 = vmatprep.subr.bf16.mxu1 %v2358_v19  ;;  %v2399_v19 = vld [vmem:[%s2940_s17 + $0x60] ss:$8 sps:$4 sm:$0xff]  }
  0xac   : > { %760 = vmatpush1.bf16.msra.mxu0 %v2360_v21  ;;  %2241 = vmatpush1.bf16.msra.mxu1 %v2360_v21  ;;  %v2400_v21 = vld [vmem:[%s2940_s17 + $0x74] ss:$8 sps:$4 sm:$0xff]  }
  0xad   : > { %761 = vmatprep.subr.bf16.mxu0 %v2361_v22  ;;  %2226 = vmatprep.subr.bf16.mxu1 %v2361_v22  ;;  %v2424_v22 = vld [vmem:[%s2940_s17 + $0xf4] ss:$8 sps:$4 sm:$0xff]  }
  0xb0   : > { %762 = vmatpush1.bf16.msra.mxu0 %v2363_v23  ;;  %2242 = vmatpush1.bf16.msra.mxu1 %v2363_v23  ;;  %v2463_v23 = vld [vmem:[#allocation7 + $0xc0] ss:$8 sps:$4 sm:$0xff]  }
  0xb1   : > { %763 = vmatprep.subr.bf16.mxu0 %v2364_v24  ;;  %2227 = vmatprep.subr.bf16.mxu1 %v2364_v24  ;;  %v2468_v24 = vld [vmem:[#allocation7 + $0xd4] ss:$8 sps:$4 sm:$0xff]  }
  0xb4   : > { %764 = vmatpush1.bf16.msra.mxu0 %v2366_v25  ;;  %2243 = vmatpush1.bf16.msra.mxu1 %v2366_v25  ;;  %v2466_v25 = vld [vmem:[#allocation7 + $0xd0] ss:$8 sps:$4 sm:$0xff]  }
  0xb5   : > { %765 = vmatprep.subr.bf16.mxu0 %v2367_v26  ;;  %2228 = vmatprep.subr.bf16.mxu1 %v2367_v26  ;;  %v2402_v26 = vld [vmem:[%s2940_s17 + $0x70] ss:$8 sps:$4 sm:$0xff]  }
  0xb8   : > { %766 = vmatpush1.bf16.msra.mxu0 %v2369_v27  ;;  %2244 = vmatpush1.bf16.msra.mxu1 %v2369_v27  ;;  %v2426_v27 = vld [vmem:[%s2940_s17 + $0xf0] ss:$8 sps:$4 sm:$0xff]   ;;  %s2689_s17 = smov [#allocation10]  }
  0xb9   : > { %767 = vmatprep.subr.bf16.mxu0 %v2370_v28  ;;  %2229 = vmatprep.subr.bf16.mxu1 %v2370_v28  ;;  %v2471_v28 = vld [vmem:[#allocation7 + $0xe4] ss:$8 sps:$4 sm:$0xff]   ;;  %s2609_s30 = sshll.u32 %s2689_s17, 4  ;;  %s2610_s30 = int_to_ptr.vmem [resolvable:$false] %s2609_s30 }
  0xba   : > { %s2611_s9 = scalar_lea.vmem %s2610_s30, 8192  ;;  %p2612_p12 = scmp.lt.s32.totalorder %s3253_s29, %s2610_s30 }
  0xbb   : > { %p2613_p1 = scmp.lt.s32.totalorder %s2611_s9, %s2605_s22 }
  0xbc   : > { %768 = vmatpush1.bf16.msra.mxu0 %v2372_v29  ;;  %2245 = vmatpush1.bf16.msra.mxu1 %v2372_v29  ;;  %v2469_v29 = vld [vmem:[#allocation7 + $0xe0] ss:$8 sps:$4 sm:$0xff]  }
  0xbd   : > { %769 = vmatprep.subr.bf16.mxu0 %v2373_v30  ;;  %2230 = vmatprep.subr.bf16.mxu1 %v2373_v30  ;;  %v2474_v30 = vld [vmem:[#allocation7 + $0xf4] ss:$8 sps:$4 sm:$0xff]   ;;  %p2614_p2 = por %p2613_p1, %p2612_p12 }
  0xbf   : > { %p2615_p4 = pnand %p2614_p2, %p2608_p7 }
  0xc0   : > { %770 = vmatpush1.bf16.msra.mxu0 %v2375_v31  ;;  %2246 = vmatpush1.bf16.msra.mxu1 %v2375_v31  ;;  %v2472_v31 = vld [vmem:[#allocation7 + $0xf0] ss:$8 sps:$4 sm:$0xff]  }
  0xc1   : > { %771 = vmatprep.subr.bf16.mxu0 %v2376_v32  ;;  %2231 = vmatprep.subr.bf16.mxu1 %v2376_v32  ;;  %v411_v32 = vlaneseq }
  0xc4   : > { %772 = vmatpush1.bf16.msra.mxu0 %v2378_v33  ;;  %2247 = vmatpush1.bf16.msra.mxu1 %v2378_v33  ;;  %v2986_v33 = vshrl.u32 %v411_v32, 7 }
  0xc5   : > { %1234 = vmatprep.subr.bf16.mxu1 %v2429_v35  ;;  %v409_v35 = vld [vmem:[%s3302_s2] sm:$0x3] }
  0xc7   : > { %774 = vmatmul.mubr.bf16.vlgmr.msra.gmra.mrb[0].mxu0 %v2379_v34  ;;  %854 = vmatmul.mubr.bf16.vlgmr.msra.gmra.mrb[0].mxu1 %v2403_v37  ;;  %v413_v34 = vsub.s32 0, %v2986_v33 }
  0xc8   : > { %783 = vmatprep.mubr.bf16.mxu0 %v2382_v36  ;;  %863 = vmatprep.mubr.bf16.mxu1 %v2406_v38  ;;  %v417_v36 = vsub.s32 1, %v2986_v33 }
  0xc9   : > { %1235 = vmatpush1.bf16.msra.mxu1 %v2427_v39  ;;  %v2995_v37 = vrot.slane %v409_v35, %v413_v34 }
  0xca   : > { %1236 = vmatprep.subr.bf16.mxu1 %v2432_v40  ;;  %v2999_v38 = vrot.slane %v409_v35, %v417_v36 }
  0xcd   : > { %1237 = vmatpush1.bf16.msra.mxu1 %v2430_v41 }
  0xce   : > { %1238 = vmatprep.subr.bf16.mxu1 %v2435_v42 }
  0xcf   : > { %784 = vmatmul.mubr.bf16.gmra.mrb[4].mxu0 %v2384_v43  ;;  %864 = vmatmul.mubr.bf16.gmra.mrb[4].mxu1 %v2408_v44 }
  0xd0   : > { %793 = vmatprep.mubr.bf16.mxu0 %v2385_v45  ;;  %873 = vmatprep.mubr.bf16.mxu1 %v2409_v46 }
  0xd1   : > { %1239 = vmatpush1.bf16.msra.mxu1 %v2433_v47 }
  0xd2   : > { %1240 = vmatprep.subr.bf16.mxu1 %v2438_v48 }
  0xd5   : > { %1241 = vmatpush1.bf16.msra.mxu1 %v2436_v49 }
  0xd6   : > { %1242 = vmatprep.subr.bf16.mxu1 %v2441_v50 }
  0xd7   : > { %794 = vmatmul.mubr.bf16.gmra.mrb[8].mxu0 %v2387_v51  ;;  %874 = vmatmul.mubr.bf16.gmra.mrb[8].mxu1 %v2411_v52 }
  0xd8   : > { %803 = vmatprep.mubr.bf16.mxu0 %v2388_v53  ;;  %883 = vmatprep.mubr.bf16.mxu1 %v2412_v54  ;;  %v2475_v54 = vld [vmem:[#allocation8 + $0x40] sm:$0xff]  }
  0xd9   : > { %1243 = vmatpush1.bf16.msra.mxu1 %v2439_v55  ;;  %v2476_v55 = vld [vmem:[#allocation8] sm:$0xff]   ;;  %2104 = vmatprep.subr.bf16.mxu0 %v2475_v54 }
  0xda   : > { %1244 = vmatprep.subr.bf16.mxu1 %v2444_v56  ;;  %2105 = vmatpush3.bf16.msra.mxu0 %v2476_v55  ;;  %v2484_v55 = vld [vmem:[#allocation8 + $0x20] sm:$0xff]  }
  0xdd   : > { %1245 = vmatpush1.bf16.msra.mxu1 %v2442_v57 }
  0xde   : > { %1246 = vmatprep.subr.bf16.mxu1 %v2447_v58 }
  0xdf   : > { %804 = vmatmul.mubr.bf16.gmra.mrb[12].mxu0 %v2390_v59  ;;  %884 = vmatmul.mubr.bf16.gmra.mrb[12].mxu1 %v2414_v60  ;;  %v2477_v59 = vld [vmem:[#allocation8 + $0x48] sm:$0xff]  }
  0xe0   : > { %813 = vmatprep.mubr.bf16.mxu0 %v2391_v61  ;;  %893 = vmatprep.mubr.bf16.mxu1 %v2415_v62 }
  0xe1   : > { %1247 = vmatpush1.bf16.msra.mxu1 %v2445_v63  ;;  %2106 = vmatprep.subr.bf16.mxu0 %v2477_v59 }
  0xe2   : > { %1248 = vmatprep.subr.bf16.mxu1 %v2450_v0 }
  0xe5   : > { %1249 = vmatpush1.bf16.msra.mxu1 %v2448_v1 }
  0xe6   : > { %1250 = vmatprep.subr.bf16.mxu1 %v2453_v2  ;;  %v2478_v2 = vld [vmem:[#allocation8 + $0x8] sm:$0xff]  }
  0xe7   : > { %814 = vmatmul.mubr.bf16.gmra.mrb[16].mxu0 %v2393_v3  ;;  %894 = vmatmul.mubr.bf16.gmra.mrb[16].mxu1 %v2417_v4 }
  0xe8   : > { %823 = vmatprep.mubr.bf16.mxu0 %v2394_v5  ;;  %903 = vmatprep.mubr.bf16.mxu1 %v2418_v6  ;;  %v2479_v5 = vld [vmem:[#allocation8 + $0x50] sm:$0xff]  }
  0xe9   : > { %1251 = vmatpush1.bf16.msra.mxu1 %v2451_v7  ;;  %2107 = vmatpush3.bf16.msra.mxu0 %v2478_v2 }
  0xea   : > { %1252 = vmatprep.subr.bf16.mxu1 %v2456_v8  ;;  %2108 = vmatprep.subr.bf16.mxu0 %v2479_v5 }
  0xed   : > { %1253 = vmatpush1.bf16.msra.mxu1 %v2454_v9 }
  0xee   : > { %1254 = vmatprep.subr.bf16.mxu1 %v2459_v10 }
  0xef   : > { %824 = vmatmul.mubr.bf16.gmra.mrb[20].mxu0 %v2396_v11  ;;  %904 = vmatmul.mubr.bf16.gmra.mrb[20].mxu1 %v2420_v12 }
  0xf0   : > { %833 = vmatprep.mubr.bf16.mxu0 %v2397_v13  ;;  %913 = vmatprep.mubr.bf16.mxu1 %v2421_v14 }
  0xf1   : > { %1255 = vmatpush1.bf16.msra.mxu1 %v2457_v15 }
  0xf2   : > { %1256 = vmatprep.subr.bf16.mxu1 %v2462_v16 }
  0xf5   : > { %1257 = vmatpush1.bf16.msra.mxu1 %v2460_v17 }
  0xf6   : > { %1258 = vmatprep.subr.bf16.mxu1 %v2465_v18  ;;  %v2480_v18 = vld [vmem:[#allocation8 + $0x10] sm:$0xff]  }
  0xf7   : > { %834 = vmatmul.mubr.bf16.gmra.mrb[24].mxu0 %v2399_v19  ;;  %914 = vmatmul.mubr.bf16.gmra.mrb[24].mxu1 %v2423_v20 }
  0xf8   : > { %843 = vmatprep.mubr.bf16.mxu0 %v2400_v21  ;;  %923 = vmatprep.mubr.bf16.mxu1 %v2424_v22 }
  0xf9   : > { %1259 = vmatpush1.bf16.msra.mxu1 %v2463_v23  ;;  %2109 = vmatpush3.bf16.msra.mxu0 %v2480_v18 }
  0xfa   : > { %1260 = vmatprep.subr.bf16.mxu1 %v2468_v24  ;;  %v2481_v24 = vld [vmem:[#allocation8 + $0x58] sm:$0xff]  }
  0xfb   : > { %2110 = vmatprep.subr.bf16.mxu0 %v2481_v24 }
  0xfd   : > { %1261 = vmatpush1.bf16.msra.mxu1 %v2466_v25 }
  0xfe   : > { %1262 = vmatprep.subr.bf16.mxu1 %v2471_v28 }
  0xff   : > { %844 = vmatmul.mubr.bf16.gmra.mrb[28].mxu0 %v2402_v26  ;;  %924 = vmatmul.mubr.bf16.gmra.mrb[28].mxu1 %v2426_v27 }
 0x101   : > { %1263 = vmatpush1.bf16.msra.mxu1 %v2469_v29 }
 0x102   : > { %1264 = vmatprep.subr.bf16.mxu1 %v2474_v30 }
 0x105   : > { %1265 = vmatpush1.bf16.msra.mxu1 %v2472_v31 }
 0x19a   : > { %v775_v39 = vpop.f32.mrb[0].mxu0  ;;  %v855_v40 = vpop.f32.mrb[0].mxu1 }
 0x19b   : > { %v776_v41 = vadd.f32 %v775_v39, %v2995_v37  ;;  %v777_v42 = vpop.f32.mrb[1].mxu0  ;;  %v856_v43 = vadd.f32 %v855_v40, %v2995_v37  ;;  %v857_v44 = vpop.f32.mrb[1].mxu1  ;;  %v2482_v39 = vld [vmem:[#allocation8 + $0x18] sm:$0xff]  }
 0x19c   : > { %v778_v45 = vadd.f32 %v777_v42, %v2999_v38  ;;  %v779_v46 = vpop.f32.mrb[2].mxu0  ;;  %v858_v47 = vadd.f32 %v857_v44, %v2999_v38  ;;  %v859_v48 = vpop.f32.mrb[2].mxu1  ;;  %v2483_v42 = vld [vmem:[#allocation8 + $0x60] sm:$0xff]   ;;  %2111 = vmatpush3.bf16.msra.mxu0 %v2482_v39 }
 0x19d   : > { %v780_v49 = vadd.f32 %v779_v46, %v2995_v37  ;;  %v781_v50 = vpop.f32.mrb[3].mxu0  ;;  %v966_v51 = vmax.f32 %v856_v43, 0.0  ;;  %v860_v52 = vadd.f32 %v859_v48, %v2995_v37  ;;  %v861_v53 = vpop.f32.mrb[3].mxu1  ;;  %v934_v60 = vmax.f32 %v776_v41, 0.0  ;;  %2112 = vmatprep.subr.bf16.mxu0 %v2483_v42 }
 0x19e   : > { %v782_v56 = vadd.f32 %v781_v50, %v2999_v38  ;;  %v967_v57 = vmax.f32 %v858_v47, 0.0  ;;  %v862_v58 = vadd.f32 %v861_v53, %v2999_v38  ;;  %v935_v63 = vmax.f32 %v778_v45, 0.0 }
 0x19f   : > { %v936_v61 = vmax.f32 %v780_v49, 0.0  ;;  %v968_v62 = vmax.f32 %v860_v52, 0.0 }
 0x1a0   : > { %v937_v0 = vmax.f32 %v782_v56, 0.0  ;;  %v969_v1 = vmax.f32 %v862_v58, 0.0  ;;  %2113 = vmatpush3.bf16.msra.mxu0 %v2484_v55 }
 0x1a1   : > { %v1031_v3 = vpack.c.bf16 %v936_v61, %v934_v60  ;;  %v3009_v4 = vpack.c.bf16 %v968_v62, %v966_v51  ;;  %v2485_v61 = vld [vmem:[#allocation8 + $0x68] sm:$0xff]  }
 0x1a2   : > { %v1032_v6 = vpack.c.bf16 %v937_v0, %v935_v63  ;;  %v785_v7 = vpop.f32.mrb[4].mxu0  ;;  %v3011_v8 = vpack.c.bf16 %v969_v1, %v967_v57  ;;  %v865_v9 = vpop.f32.mrb[4].mxu1  ;;  %2114 = vmatprep.subr.bf16.mxu0 %v2485_v61 }
 0x1a3   : > { %v786_v10 = vadd.f32 %v785_v7, %v2995_v37  ;;  %v787_v11 = vpop.f32.mrb[5].mxu0  ;;  %v866_v12 = vadd.f32 %v865_v9, %v2995_v37  ;;  %v867_v13 = vpop.f32.mrb[5].mxu1  ;;  %v2486_v9 = vld [vmem:[#allocation8 + $0x28] sm:$0xff]  }
 0x1a4   : > { %v788_v14 = vadd.f32 %v787_v11, %v2999_v38  ;;  %v789_v15 = vpop.f32.mrb[6].mxu0  ;;  %1266 = vmatprep.mubr.bf16.mxu1 %v1032_v6  ;;  %v868_v16 = vadd.f32 %v867_v13, %v2999_v38  ;;  %v869_v17 = vpop.f32.mrb[6].mxu1  ;;  %2115 = vmatpush3.bf16.msra.mxu0 %v2486_v9 }
 0x1a5   : > { %v790_v19 = vadd.f32 %v789_v15, %v2995_v37  ;;  %v791_v20 = vpop.f32.mrb[7].mxu0  ;;  %1267 = vmatmul.mubr.bf16.vlgmr.msra.gmra.mrb[32].mxu1 %v1031_v3  ;;  %v970_v21 = vmax.f32 %v866_v12, 0.0  ;;  %v870_v22 = vadd.f32 %v869_v17, %v2995_v37  ;;  %v871_v23 = vpop.f32.mrb[7].mxu1  ;;  %v938_v28 = vmax.f32 %v786_v10, 0.0  ;;  %v2487_v12 = vld [vmem:[#allocation8 + $0x70] sm:$0xff]  }
 0x1a6   : > { %v792_v25 = vadd.f32 %v791_v20, %v2999_v38  ;;  %v971_v26 = vmax.f32 %v868_v16, 0.0  ;;  %v872_v27 = vadd.f32 %v871_v23, %v2999_v38  ;;  %v939_v31 = vmax.f32 %v788_v14, 0.0  ;;  %2116 = vmatprep.subr.bf16.mxu0 %v2487_v12 }
 0x1a7   : > { %v940_v29 = vmax.f32 %v790_v19, 0.0  ;;  %v972_v30 = vmax.f32 %v870_v22, 0.0 }
 0x1a8   : > { %v941_v32 = vmax.f32 %v792_v25, 0.0  ;;  %v973_v35 = vmax.f32 %v872_v27, 0.0  ;;  %v2488_v25 = vld [vmem:[#allocation8 + $0x30] sm:$0xff]  }
 0x1a9   : > { %v1033_v40 = vpack.c.bf16 %v940_v29, %v938_v28  ;;  %v3021_v41 = vpack.c.bf16 %v972_v30, %v970_v21  ;;  %2117 = vmatpush3.bf16.msra.mxu0 %v2488_v25 }
 0x1aa   : > { %v1034_v43 = vpack.c.bf16 %v941_v32, %v939_v31  ;;  %v795_v44 = vpop.f32.mrb[8].mxu0  ;;  %v3023_v45 = vpack.c.bf16 %v973_v35, %v971_v26  ;;  %v875_v46 = vpop.f32.mrb[8].mxu1 }
 0x1ab   : > { %v796_v47 = vadd.f32 %v795_v44, %v2995_v37  ;;  %v797_v48 = vpop.f32.mrb[9].mxu0  ;;  %v876_v49 = vadd.f32 %v875_v46, %v2995_v37  ;;  %v877_v50 = vpop.f32.mrb[9].mxu1 }
 0x1ac   : > { %v798_v51 = vadd.f32 %v797_v48, %v2999_v38  ;;  %v799_v52 = vpop.f32.mrb[10].mxu0  ;;  %1276 = vmatprep.mubr.bf16.mxu1 %v1034_v43  ;;  %v878_v53 = vadd.f32 %v877_v50, %v2999_v38  ;;  %v879_v54 = vpop.f32.mrb[10].mxu1 }
 0x1ad   : > { %v800_v56 = vadd.f32 %v799_v52, %v2995_v37  ;;  %v801_v57 = vpop.f32.mrb[11].mxu0  ;;  %1277 = vmatmul.mubr.bf16.gmra.mrb[36].mxu1 %v1033_v40  ;;  %v974_v58 = vmax.f32 %v876_v49, 0.0  ;;  %v880_v59 = vadd.f32 %v879_v54, %v2995_v37  ;;  %v881_v60 = vpop.f32.mrb[11].mxu1  ;;  %v942_v1 = vmax.f32 %v796_v47, 0.0 }
 0x1ae   : > { %v802_v62 = vadd.f32 %v801_v57, %v2999_v38  ;;  %v975_v63 = vmax.f32 %v878_v53, 0.0  ;;  %v882_v0 = vadd.f32 %v881_v60, %v2999_v38  ;;  %v943_v5 = vmax.f32 %v798_v51, 0.0 }
 0x1af   : > { %v944_v2 = vmax.f32 %v800_v56, 0.0  ;;  %v976_v3 = vmax.f32 %v880_v59, 0.0 }
 0x1b0   : > { %v945_v6 = vmax.f32 %v802_v62, 0.0  ;;  %v977_v7 = vmax.f32 %v882_v0, 0.0 }
 0x1b1   : > { %v1035_v10 = vpack.c.bf16 %v944_v2, %v942_v1  ;;  %v3033_v11 = vpack.c.bf16 %v976_v3, %v974_v58 }
 0x1b2   : > { %v1036_v13 = vpack.c.bf16 %v945_v6, %v943_v5  ;;  %v805_v14 = vpop.f32.mrb[12].mxu0  ;;  %v3035_v15 = vpack.c.bf16 %v977_v7, %v975_v63  ;;  %v885_v16 = vpop.f32.mrb[12].mxu1 }
 0x1b3   : > { %v806_v17 = vadd.f32 %v805_v14, %v2995_v37  ;;  %v807_v18 = vpop.f32.mrb[13].mxu0  ;;  %v886_v19 = vadd.f32 %v885_v16, %v2995_v37  ;;  %v887_v20 = vpop.f32.mrb[13].mxu1 }
 0x1b4   : > { %v808_v21 = vadd.f32 %v807_v18, %v2999_v38  ;;  %v809_v22 = vpop.f32.mrb[14].mxu0  ;;  %1286 = vmatprep.mubr.bf16.mxu1 %v1036_v13  ;;  %v888_v23 = vadd.f32 %v887_v20, %v2999_v38  ;;  %v889_v24 = vpop.f32.mrb[14].mxu1 }
 0x1b5   : > { %v810_v26 = vadd.f32 %v809_v22, %v2995_v37  ;;  %v811_v27 = vpop.f32.mrb[15].mxu0  ;;  %1287 = vmatmul.mubr.bf16.gmra.mrb[40].mxu1 %v1035_v10  ;;  %v978_v28 = vmax.f32 %v886_v19, 0.0  ;;  %v890_v29 = vadd.f32 %v889_v24, %v2995_v37  ;;  %v891_v30 = vpop.f32.mrb[15].mxu1  ;;  %v946_v39 = vmax.f32 %v806_v17, 0.0 }
 0x1b6   : > { %v812_v31 = vadd.f32 %v811_v27, %v2999_v38  ;;  %v979_v32 = vmax.f32 %v888_v23, 0.0  ;;  %v892_v35 = vadd.f32 %v891_v30, %v2999_v38  ;;  %v947_v43 = vmax.f32 %v808_v21, 0.0 }
 0x1b7   : > { %v948_v40 = vmax.f32 %v810_v26, 0.0  ;;  %v980_v42 = vmax.f32 %v890_v29, 0.0 }
 0x1b8   : > { %v949_v44 = vmax.f32 %v812_v31, 0.0  ;;  %v981_v46 = vmax.f32 %v892_v35, 0.0 }
 0x1b9   : > { %v1037_v47 = vpack.c.bf16 %v948_v40, %v946_v39  ;;  %v3045_v48 = vpack.c.bf16 %v980_v42, %v978_v28 }
 0x1ba   : > { %v1038_v49 = vpack.c.bf16 %v949_v44, %v947_v43  ;;  %v815_v50 = vpop.f32.mrb[16].mxu0  ;;  %v3047_v51 = vpack.c.bf16 %v981_v46, %v979_v32  ;;  %v895_v52 = vpop.f32.mrb[16].mxu1 }
 0x1bb   : > { %v816_v53 = vadd.f32 %v815_v50, %v2995_v37  ;;  %v817_v54 = vpop.f32.mrb[17].mxu0  ;;  %v896_v55 = vadd.f32 %v895_v52, %v2995_v37  ;;  %v897_v56 = vpop.f32.mrb[17].mxu1 }
 0x1bc   : > { %v818_v57 = vadd.f32 %v817_v54, %v2999_v38  ;;  %v819_v58 = vpop.f32.mrb[18].mxu0  ;;  %1296 = vmatprep.mubr.bf16.mxu1 %v1038_v49  ;;  %v898_v59 = vadd.f32 %v897_v56, %v2999_v38  ;;  %v899_v60 = vpop.f32.mrb[18].mxu1 }
 0x1bd   : > { %v820_v61 = vadd.f32 %v819_v58, %v2995_v37  ;;  %v821_v62 = vpop.f32.mrb[19].mxu0  ;;  %1297 = vmatmul.mubr.bf16.gmra.mrb[44].mxu1 %v1037_v47  ;;  %v982_v63 = vmax.f32 %v896_v55, 0.0  ;;  %v900_v0 = vadd.f32 %v899_v60, %v2995_v37  ;;  %v901_v1 = vpop.f32.mrb[19].mxu1  ;;  %v950_v6 = vmax.f32 %v816_v53, 0.0 }
 0x1be   : > { %v822_v2 = vadd.f32 %v821_v62, %v2999_v38  ;;  %v983_v3 = vmax.f32 %v898_v59, 0.0  ;;  %v902_v5 = vadd.f32 %v901_v1, %v2999_v38  ;;  %v951_v10 = vmax.f32 %v818_v57, 0.0 }
 0x1bf   : > { %v952_v7 = vmax.f32 %v820_v61, 0.0  ;;  %v984_v9 = vmax.f32 %v900_v0, 0.0 }
 0x1c0   : > { %v953_v12 = vmax.f32 %v822_v2, 0.0  ;;  %v985_v13 = vmax.f32 %v902_v5, 0.0 }
 0x1c1   : > { %v1039_v14 = vpack.c.bf16 %v952_v7, %v950_v6  ;;  %v3057_v16 = vpack.c.bf16 %v984_v9, %v982_v63 }
 0x1c2   : > { %v1040_v17 = vpack.c.bf16 %v953_v12, %v951_v10  ;;  %v825_v18 = vpop.f32.mrb[20].mxu0  ;;  %v3059_v19 = vpack.c.bf16 %v985_v13, %v983_v3  ;;  %v905_v20 = vpop.f32.mrb[20].mxu1 }
 0x1c3   : > { %v826_v21 = vadd.f32 %v825_v18, %v2995_v37  ;;  %v827_v22 = vpop.f32.mrb[21].mxu0  ;;  %v906_v23 = vadd.f32 %v905_v20, %v2995_v37  ;;  %v907_v24 = vpop.f32.mrb[21].mxu1 }
 0x1c4   : > { %v828_v25 = vadd.f32 %v827_v22, %v2999_v38  ;;  %v829_v26 = vpop.f32.mrb[22].mxu0  ;;  %1306 = vmatprep.mubr.bf16.mxu1 %v1040_v17  ;;  %v908_v27 = vadd.f32 %v907_v24, %v2999_v38  ;;  %v909_v28 = vpop.f32.mrb[22].mxu1 }
 0x1c5   : > { %v830_v29 = vadd.f32 %v829_v26, %v2995_v37  ;;  %v831_v30 = vpop.f32.mrb[23].mxu0  ;;  %1307 = vmatmul.mubr.bf16.gmra.mrb[48].mxu1 %v1039_v14  ;;  %v986_v31 = vmax.f32 %v906_v23, 0.0  ;;  %v910_v32 = vadd.f32 %v909_v28, %v2995_v37  ;;  %v911_v35 = vpop.f32.mrb[23].mxu1  ;;  %v954_v43 = vmax.f32 %v826_v21, 0.0 }
 0x1c6   : > { %v832_v39 = vadd.f32 %v831_v30, %v2999_v38  ;;  %v987_v40 = vmax.f32 %v908_v27, 0.0  ;;  %v912_v42 = vadd.f32 %v911_v35, %v2999_v38  ;;  %v955_v47 = vmax.f32 %v828_v25, 0.0 }
 0x1c7   : > { %v956_v44 = vmax.f32 %v830_v29, 0.0  ;;  %v988_v46 = vmax.f32 %v910_v32, 0.0 }
 0x1c8   : > { %v957_v49 = vmax.f32 %v832_v39, 0.0  ;;  %v989_v50 = vmax.f32 %v912_v42, 0.0 }
 0x1c9   : > { %v1041_v52 = vpack.c.bf16 %v956_v44, %v954_v43  ;;  %v3069_v53 = vpack.c.bf16 %v988_v46, %v986_v31 }
 0x1ca   : > { %v1042_v54 = vpack.c.bf16 %v957_v49, %v955_v47  ;;  %v835_v55 = vpop.f32.mrb[24].mxu0  ;;  %v3071_v56 = vpack.c.bf16 %v989_v50, %v987_v40  ;;  %v915_v57 = vpop.f32.mrb[24].mxu1 }
 0x1cb   : > { %v836_v58 = vadd.f32 %v835_v55, %v2995_v37  ;;  %v837_v59 = vpop.f32.mrb[25].mxu0  ;;  %v916_v60 = vadd.f32 %v915_v57, %v2995_v37  ;;  %v917_v61 = vpop.f32.mrb[25].mxu1 }
 0x1cc   : > { %v838_v62 = vadd.f32 %v837_v59, %v2999_v38  ;;  %v839_v63 = vpop.f32.mrb[26].mxu0  ;;  %1316 = vmatprep.mubr.bf16.mxu1 %v1042_v54  ;;  %v918_v0 = vadd.f32 %v917_v61, %v2999_v38  ;;  %v919_v1 = vpop.f32.mrb[26].mxu1 }
 0x1cd   : > { %v840_v2 = vadd.f32 %v839_v63, %v2995_v37  ;;  %v841_v3 = vpop.f32.mrb[27].mxu0  ;;  %1317 = vmatmul.mubr.bf16.gmra.mrb[52].mxu1 %v1041_v52  ;;  %v990_v5 = vmax.f32 %v916_v60, 0.0  ;;  %v920_v6 = vadd.f32 %v919_v1, %v2995_v37  ;;  %v921_v7 = vpop.f32.mrb[27].mxu1  ;;  %v958_v13 = vmax.f32 %v836_v58, 0.0 }
 0x1ce   : > { %v842_v9 = vadd.f32 %v841_v3, %v2999_v38  ;;  %v991_v10 = vmax.f32 %v918_v0, 0.0  ;;  %v922_v12 = vadd.f32 %v921_v7, %v2999_v38  ;;  %v959_v18 = vmax.f32 %v838_v62, 0.0 }
 0x1cf   : > { %v960_v14 = vmax.f32 %v840_v2, 0.0  ;;  %v992_v17 = vmax.f32 %v920_v6, 0.0 }
 0x1d0   : > { %v961_v20 = vmax.f32 %v842_v9, 0.0  ;;  %v993_v21 = vmax.f32 %v922_v12, 0.0 }
 0x1d1   : > { %v1043_v22 = vpack.c.bf16 %v960_v14, %v958_v13  ;;  %v1059_v23 = vpack.c.bf16 %v992_v17, %v990_v5 }
 0x1d2   : > { %v1044_v24 = vpack.c.bf16 %v961_v20, %v959_v18  ;;  %v845_v25 = vpop.f32.mrb[28].mxu0  ;;  %v1060_v26 = vpack.c.bf16 %v993_v21, %v991_v10  ;;  %v925_v27 = vpop.f32.mrb[28].mxu1 }
 0x1d3   : > { %v846_v28 = vadd.f32 %v845_v25, %v2995_v37  ;;  %v847_v29 = vpop.f32.mrb[29].mxu0  ;;  %v926_v30 = vadd.f32 %v925_v27, %v2995_v37  ;;  %v927_v31 = vpop.f32.mrb[29].mxu1 }
 0x1d4   : > { %v848_v32 = vadd.f32 %v847_v29, %v2999_v38  ;;  %v849_v35 = vpop.f32.mrb[30].mxu0  ;;  %1326 = vmatprep.mubr.bf16.mxu1 %v1044_v24  ;;  %v928_v39 = vadd.f32 %v927_v31, %v2999_v38  ;;  %v929_v40 = vpop.f32.mrb[30].mxu1 }
 0x1d5   : > { %v850_v42 = vadd.f32 %v849_v35, %v2995_v37  ;;  %v851_v43 = vpop.f32.mrb[31].mxu0  ;;  %1327 = vmatmul.mubr.bf16.gmra.mrb[56].mxu1 %v1043_v22  ;;  %v994_v44 = vmax.f32 %v926_v30, 0.0  ;;  %v930_v46 = vadd.f32 %v929_v40, %v2995_v37  ;;  %v931_v47 = vpop.f32.mrb[31].mxu1  ;;  %v962_v54 = vmax.f32 %v846_v28, 0.0  ;;  %v2489_v37 = vld [vmem:[#allocation8 + $0x78] sm:$0xff]  }
 0x1d6   : > { %v852_v49 = vadd.f32 %v851_v43, %v2999_v38  ;;  %v995_v50 = vmax.f32 %v928_v39, 0.0  ;;  %v932_v52 = vadd.f32 %v931_v47, %v2999_v38  ;;  %v963_v58 = vmax.f32 %v848_v32, 0.0  ;;  %v2490_v38 = vld [vmem:[#allocation8 + $0x38] sm:$0xff]   ;;  %2118 = vmatprep.subr.bf16.mxu0 %v2489_v37 }
 0x1d7   : > { %v964_v55 = vmax.f32 %v850_v42, 0.0  ;;  %v996_v57 = vmax.f32 %v930_v46, 0.0  ;;  %2119 = vmatpush3.bf16.msra.mxu0 %v2490_v38 }
 0x1d8   : > { %v965_v59 = vmax.f32 %v852_v49, 0.0  ;;  %v997_v60 = vmax.f32 %v932_v52, 0.0 }
 0x1d9   : > { %v1045_v61 = vpack.c.bf16 %v964_v55, %v962_v54  ;;  %v1061_v62 = vpack.c.bf16 %v996_v57, %v994_v44 }
 0x1da   : > { %v1046_v63 = vpack.c.bf16 %v965_v59, %v963_v58  ;;  %v1062_v0 = vpack.c.bf16 %v997_v60, %v995_v50 }
 0x1dc   : > { %1336 = vmatprep.mubr.bf16.mxu1 %v1046_v63 }
 0x1dd   : > { %1337 = vmatmul.mubr.bf16.gmra.mrb[60].mxu1 %v1045_v61 }
 0x1de   : > { %1346 = vmatprep.mubr.bf16.mxu1 %v3011_v8 }
 0x1e5   : > { %1347 = vmatmul.mubr.bf16.gmra.mrb[64].mxu1 %v3009_v4  ;;  %v1030_v4 = vld [vmem:[%s3304_s4] sm:$0x3] }
 0x1e6   : > { %1356 = vmatprep.mubr.bf16.mxu1 %v3023_v45  ;;  %v3106_v8 = vrot.slane %v1030_v4, %v413_v34 }
 0x1ed   : > { %1357 = vmatmul.mubr.bf16.gmra.mrb[68].mxu1 %v3021_v41  ;;  %v3110_v41 = vrot.slane %v1030_v4, %v417_v36 }
 0x1ee   : > { %1366 = vmatprep.mubr.bf16.mxu1 %v3035_v15 }
 0x1f5   : > { %1367 = vmatmul.mubr.bf16.gmra.mrb[72].mxu1 %v3033_v11 }
 0x1f6   : > { %1376 = vmatprep.mubr.bf16.mxu1 %v3047_v51 }
 0x1fd   : > { %1377 = vmatmul.mubr.bf16.gmra.mrb[76].mxu1 %v3045_v48 }
 0x1fe   : > { %1386 = vmatprep.mubr.bf16.mxu1 %v3059_v19 }
 0x205   : > { %1387 = vmatmul.mubr.bf16.gmra.mrb[80].mxu1 %v3057_v16 }
 0x206   : > { %1396 = vmatprep.mubr.bf16.mxu1 %v3071_v56 }
 0x20d   : > { %1397 = vmatmul.mubr.bf16.gmra.mrb[84].mxu1 %v3069_v53 }
 0x20e   : > { %1406 = vmatprep.mubr.bf16.mxu1 %v1060_v26 }
 0x215   : > { %1407 = vmatmul.mubr.bf16.gmra.mrb[88].mxu1 %v1059_v23 }
 0x216   : > { %1416 = vmatprep.mubr.bf16.mxu1 %v1062_v0 }
 0x21d   : > { %1417 = vmatmul.mubr.bf16.gmra.mrb[92].mxu1 %v1061_v62 }
 0x278   : > { %v1268_v45 = vpop.f32.mrb[32].mxu1 }
 0x279   : > { %v1269_v11 = vadd.f32 %v1268_v45, %v3106_v8  ;;  %v1270_v15 = vpop.f32.mrb[33].mxu1 }
 0x27a   : > { %v1271_v48 = vadd.f32 %v1270_v15, %v3110_v41  ;;  %v1272_v51 = vpop.f32.mrb[34].mxu1 }
 0x27b   : > { %v1273_v16 = vadd.f32 %v1272_v51, %v3106_v8  ;;  %v1274_v19 = vpop.f32.mrb[35].mxu1  ;;  %v1427_v56 = vmax.f32 %v1269_v11, 0.0 }
 0x27c   : > { %v1275_v53 = vadd.f32 %v1274_v19, %v3110_v41  ;;  %v1428_v34 = vmax.f32 %v1271_v48, 0.0 }
 0x27d   : > { %v1429_v1 = vmax.f32 %v1273_v16, 0.0 }
 0x27e   : > { %v1430_v2 = vmax.f32 %v1275_v53, 0.0 }
 0x27f   : > { %v1524_v3 = vpack.c.bf16 %v1429_v1, %v1427_v56 }
 0x280   : > { %v1525_v33 = vpack.c.bf16 %v1430_v2, %v1428_v34  ;;  %v1278_v36 = vpop.f32.mrb[36].mxu1 }
 0x281   : > { %v1279_v5 = vadd.f32 %v1278_v36, %v3106_v8  ;;  %v1280_v6 = vpop.f32.mrb[37].mxu1 }
 0x282   : > { %v1281_v7 = vadd.f32 %v1280_v6, %v3110_v41  ;;  %v1282_v9 = vpop.f32.mrb[38].mxu1  ;;  %1690 = vmatprep.mubr.bf16.mxu0 %v1525_v33 }
 0x283   : > { %v1283_v10 = vadd.f32 %v1282_v9, %v3106_v8  ;;  %v1284_v12 = vpop.f32.mrb[39].mxu1  ;;  %1691 = vmatmul.mubr.bf16.vlgmr.msra.gmra.mrb[32].mxu0 %v1524_v3  ;;  %v1431_v14 = vmax.f32 %v1279_v5, 0.0 }
 0x284   : > { %v1285_v13 = vadd.f32 %v1284_v12, %v3110_v41  ;;  %v1432_v18 = vmax.f32 %v1281_v7, 0.0 }
 0x285   : > { %v1433_v17 = vmax.f32 %v1283_v10, 0.0 }
 0x286   : > { %v1434_v20 = vmax.f32 %v1285_v13, 0.0 }
 0x287   : > { %v1526_v21 = vpack.c.bf16 %v1433_v17, %v1431_v14 }
 0x288   : > { %v1527_v22 = vpack.c.bf16 %v1434_v20, %v1432_v18  ;;  %v1288_v23 = vpop.f32.mrb[40].mxu1 }
 0x289   : > { %v1289_v24 = vadd.f32 %v1288_v23, %v3106_v8  ;;  %v1290_v25 = vpop.f32.mrb[41].mxu1 }
 0x28a   : > { %v1291_v26 = vadd.f32 %v1290_v25, %v3110_v41  ;;  %v1292_v27 = vpop.f32.mrb[42].mxu1  ;;  %1698 = vmatprep.mubr.bf16.mxu0 %v1527_v22 }
 0x28b   : > { %v1293_v28 = vadd.f32 %v1292_v27, %v3106_v8  ;;  %v1294_v29 = vpop.f32.mrb[43].mxu1  ;;  %1699 = vmatmul.mubr.bf16.gmra.mrb[36].mxu0 %v1526_v21  ;;  %v1435_v31 = vmax.f32 %v1289_v24, 0.0 }
 0x28c   : > { %v1295_v30 = vadd.f32 %v1294_v29, %v3110_v41  ;;  %v1436_v35 = vmax.f32 %v1291_v26, 0.0 }
 0x28d   : > { %v1437_v32 = vmax.f32 %v1293_v28, 0.0 }
 0x28e   : > { %v1438_v39 = vmax.f32 %v1295_v30, 0.0 }
 0x28f   : > { %v1528_v40 = vpack.c.bf16 %v1437_v32, %v1435_v31 }
 0x290   : > { %v1529_v42 = vpack.c.bf16 %v1438_v39, %v1436_v35  ;;  %v1298_v43 = vpop.f32.mrb[44].mxu1 }
 0x291   : > { %v1299_v44 = vadd.f32 %v1298_v43, %v3106_v8  ;;  %v1300_v46 = vpop.f32.mrb[45].mxu1 }
 0x292   : > { %v1301_v47 = vadd.f32 %v1300_v46, %v3110_v41  ;;  %v1302_v49 = vpop.f32.mrb[46].mxu1  ;;  %1706 = vmatprep.mubr.bf16.mxu0 %v1529_v42 }
 0x293   : > { %v1303_v50 = vadd.f32 %v1302_v49, %v3106_v8  ;;  %v1304_v52 = vpop.f32.mrb[47].mxu1  ;;  %1707 = vmatmul.mubr.bf16.gmra.mrb[40].mxu0 %v1528_v40  ;;  %v1439_v55 = vmax.f32 %v1299_v44, 0.0 }
 0x294   : > { %v1305_v54 = vadd.f32 %v1304_v52, %v3110_v41  ;;  %v1440_v58 = vmax.f32 %v1301_v47, 0.0 }
 0x295   : > { %v1441_v57 = vmax.f32 %v1303_v50, 0.0 }
 0x296   : > { %v1442_v59 = vmax.f32 %v1305_v54, 0.0 }
 0x297   : > { %v1530_v60 = vpack.c.bf16 %v1441_v57, %v1439_v55 }
 0x298   : > { %v1531_v61 = vpack.c.bf16 %v1442_v59, %v1440_v58  ;;  %v1308_v62 = vpop.f32.mrb[48].mxu1 }
 0x299   : > { %v1309_v63 = vadd.f32 %v1308_v62, %v3106_v8  ;;  %v1310_v0 = vpop.f32.mrb[49].mxu1 }
 0x29a   : > { %v1311_v37 = vadd.f32 %v1310_v0, %v3110_v41  ;;  %v1312_v38 = vpop.f32.mrb[50].mxu1  ;;  %1714 = vmatprep.mubr.bf16.mxu0 %v1531_v61 }
 0x29b   : > { %v1313_v4 = vadd.f32 %v1312_v38, %v3106_v8  ;;  %v1314_v45 = vpop.f32.mrb[51].mxu1  ;;  %1715 = vmatmul.mubr.bf16.gmra.mrb[44].mxu0 %v1530_v60  ;;  %v1443_v15 = vmax.f32 %v1309_v63, 0.0 }
 0x29c   : > { %v1315_v11 = vadd.f32 %v1314_v45, %v3110_v41  ;;  %v1444_v51 = vmax.f32 %v1311_v37, 0.0 }
 0x29d   : > { %v1445_v48 = vmax.f32 %v1313_v4, 0.0 }
 0x29e   : > { %v1446_v16 = vmax.f32 %v1315_v11, 0.0 }
 0x29f   : > { %v1532_v19 = vpack.c.bf16 %v1445_v48, %v1443_v15 }
 0x2a0   : > { %v1533_v53 = vpack.c.bf16 %v1446_v16, %v1444_v51  ;;  %v1318_v56 = vpop.f32.mrb[52].mxu1 }
 0x2a1   : > { %v1319_v1 = vadd.f32 %v1318_v56, %v3106_v8  ;;  %v1320_v34 = vpop.f32.mrb[53].mxu1 }
 0x2a2   : > { %v1321_v2 = vadd.f32 %v1320_v34, %v3110_v41  ;;  %v1322_v3 = vpop.f32.mrb[54].mxu1  ;;  %1722 = vmatprep.mubr.bf16.mxu0 %v1533_v53 }
 0x2a3   : > { %v1323_v33 = vadd.f32 %v1322_v3, %v3106_v8  ;;  %v1324_v36 = vpop.f32.mrb[55].mxu1  ;;  %1723 = vmatmul.mubr.bf16.gmra.mrb[48].mxu0 %v1532_v19  ;;  %v1447_v6 = vmax.f32 %v1319_v1, 0.0 }
 0x2a4   : > { %v1325_v5 = vadd.f32 %v1324_v36, %v3110_v41  ;;  %v1448_v9 = vmax.f32 %v1321_v2, 0.0 }
 0x2a5   : > { %v1449_v7 = vmax.f32 %v1323_v33, 0.0 }
 0x2a6   : > { %v1450_v10 = vmax.f32 %v1325_v5, 0.0 }
 0x2a7   : > { %v1534_v12 = vpack.c.bf16 %v1449_v7, %v1447_v6 }
 0x2a8   : > { %v1535_v13 = vpack.c.bf16 %v1450_v10, %v1448_v9  ;;  %v1328_v14 = vpop.f32.mrb[56].mxu1 }
 0x2a9   : > { %v1329_v17 = vadd.f32 %v1328_v14, %v3106_v8  ;;  %v1330_v18 = vpop.f32.mrb[57].mxu1 }
 0x2aa   : > { %v1331_v20 = vadd.f32 %v1330_v18, %v3110_v41  ;;  %v1332_v21 = vpop.f32.mrb[58].mxu1  ;;  %1730 = vmatprep.mubr.bf16.mxu0 %v1535_v13 }
 0x2ab   : > { %v1333_v22 = vadd.f32 %v1332_v21, %v3106_v8  ;;  %v1334_v23 = vpop.f32.mrb[59].mxu1  ;;  %1731 = vmatmul.mubr.bf16.gmra.mrb[52].mxu0 %v1534_v12  ;;  %v1451_v25 = vmax.f32 %v1329_v17, 0.0 }
 0x2ac   : > { %v1335_v24 = vadd.f32 %v1334_v23, %v3110_v41  ;;  %v1452_v27 = vmax.f32 %v1331_v20, 0.0 }
 0x2ad   : > { %v1453_v26 = vmax.f32 %v1333_v22, 0.0 }
 0x2ae   : > { %v1454_v28 = vmax.f32 %v1335_v24, 0.0 }
 0x2af   : > { %v1536_v29 = vpack.c.bf16 %v1453_v26, %v1451_v25 }
 0x2b0   : > { %v1537_v30 = vpack.c.bf16 %v1454_v28, %v1452_v27  ;;  %v1338_v31 = vpop.f32.mrb[60].mxu1 }
 0x2b1   : > { %v1339_v32 = vadd.f32 %v1338_v31, %v3106_v8  ;;  %v1340_v35 = vpop.f32.mrb[61].mxu1 }
 0x2b2   : > { %v1341_v39 = vadd.f32 %v1340_v35, %v3110_v41  ;;  %v1342_v40 = vpop.f32.mrb[62].mxu1  ;;  %1738 = vmatprep.mubr.bf16.mxu0 %v1537_v30 }
 0x2b3   : > { %v1343_v42 = vadd.f32 %v1342_v40, %v3106_v8  ;;  %v1344_v43 = vpop.f32.mrb[63].mxu1  ;;  %1739 = vmatmul.mubr.bf16.gmra.mrb[56].mxu0 %v1536_v29  ;;  %v1455_v46 = vmax.f32 %v1339_v32, 0.0 }
 0x2b4   : > { %v1345_v44 = vadd.f32 %v1344_v43, %v3110_v41  ;;  %v1456_v49 = vmax.f32 %v1341_v39, 0.0 }
 0x2b5   : > { %v1457_v47 = vmax.f32 %v1343_v42, 0.0 }
 0x2b6   : > { %v1458_v50 = vmax.f32 %v1345_v44, 0.0 }
 0x2b7   : > { %v1538_v52 = vpack.c.bf16 %v1457_v47, %v1455_v46 }
 0x2b8   : > { %v1539_v54 = vpack.c.bf16 %v1458_v50, %v1456_v49  ;;  %v1348_v55 = vpop.f32.mrb[64].mxu1 }
 0x2b9   : > { %v1349_v57 = vadd.f32 %v1348_v55, %v3106_v8  ;;  %v1350_v58 = vpop.f32.mrb[65].mxu1 }
 0x2ba   : > { %v1351_v59 = vadd.f32 %v1350_v58, %v3110_v41  ;;  %v1352_v60 = vpop.f32.mrb[66].mxu1  ;;  %1746 = vmatprep.mubr.bf16.mxu0 %v1539_v54 }
 0x2bb   : > { %v1353_v61 = vadd.f32 %v1352_v60, %v3106_v8  ;;  %v1354_v62 = vpop.f32.mrb[67].mxu1  ;;  %1747 = vmatmul.mubr.bf16.gmra.mrb[60].mxu0 %v1538_v52  ;;  %v1459_v0 = vmax.f32 %v1349_v57, 0.0 }
 0x2bc   : > { %v1355_v63 = vadd.f32 %v1354_v62, %v3110_v41  ;;  %v1460_v38 = vmax.f32 %v1351_v59, 0.0 }
 0x2bd   : > { %v1461_v37 = vmax.f32 %v1353_v61, 0.0 }
 0x2be   : > { %v1462_v4 = vmax.f32 %v1355_v63, 0.0 }
 0x2bf   : > { %v1540_v45 = vpack.c.bf16 %v1461_v37, %v1459_v0 }
 0x2c0   : > { %v1541_v11 = vpack.c.bf16 %v1462_v4, %v1460_v38  ;;  %v1358_v15 = vpop.f32.mrb[68].mxu1 }
 0x2c1   : > { %v1359_v48 = vadd.f32 %v1358_v15, %v3106_v8  ;;  %v1360_v51 = vpop.f32.mrb[69].mxu1 }
 0x2c2   : > { %v1361_v16 = vadd.f32 %v1360_v51, %v3110_v41  ;;  %v1362_v19 = vpop.f32.mrb[70].mxu1  ;;  %1754 = vmatprep.mubr.bf16.mxu0 %v1541_v11 }
 0x2c3   : > { %v1363_v53 = vadd.f32 %v1362_v19, %v3106_v8  ;;  %v1364_v56 = vpop.f32.mrb[71].mxu1  ;;  %1755 = vmatmul.mubr.bf16.gmra.mrb[64].mxu0 %v1540_v45  ;;  %v1463_v34 = vmax.f32 %v1359_v48, 0.0 }
 0x2c4   : > { %v1365_v1 = vadd.f32 %v1364_v56, %v3110_v41  ;;  %v1464_v3 = vmax.f32 %v1361_v16, 0.0 }
 0x2c5   : > { %v1465_v2 = vmax.f32 %v1363_v53, 0.0 }
 0x2c6   : > { %v1466_v33 = vmax.f32 %v1365_v1, 0.0 }
 0x2c7   : > { %v1542_v36 = vpack.c.bf16 %v1465_v2, %v1463_v34 }
 0x2c8   : > { %v1543_v5 = vpack.c.bf16 %v1466_v33, %v1464_v3  ;;  %v1368_v6 = vpop.f32.mrb[72].mxu1 }
 0x2c9   : > { %v1369_v7 = vadd.f32 %v1368_v6, %v3106_v8  ;;  %v1370_v9 = vpop.f32.mrb[73].mxu1 }
 0x2ca   : > { %v1371_v10 = vadd.f32 %v1370_v9, %v3110_v41  ;;  %v1372_v12 = vpop.f32.mrb[74].mxu1  ;;  %1762 = vmatprep.mubr.bf16.mxu0 %v1543_v5 }
 0x2cb   : > { %v1373_v13 = vadd.f32 %v1372_v12, %v3106_v8  ;;  %v1374_v14 = vpop.f32.mrb[75].mxu1  ;;  %1763 = vmatmul.mubr.bf16.gmra.mrb[68].mxu0 %v1542_v36  ;;  %v1467_v18 = vmax.f32 %v1369_v7, 0.0 }
 0x2cc   : > { %v1375_v17 = vadd.f32 %v1374_v14, %v3110_v41  ;;  %v1468_v21 = vmax.f32 %v1371_v10, 0.0 }
 0x2cd   : > { %v1469_v20 = vmax.f32 %v1373_v13, 0.0 }
 0x2ce   : > { %v1470_v22 = vmax.f32 %v1375_v17, 0.0 }
 0x2cf   : > { %v1544_v23 = vpack.c.bf16 %v1469_v20, %v1467_v18 }
 0x2d0   : > { %v1545_v24 = vpack.c.bf16 %v1470_v22, %v1468_v21  ;;  %v1378_v25 = vpop.f32.mrb[76].mxu1 }
 0x2d1   : > { %v1379_v26 = vadd.f32 %v1378_v25, %v3106_v8  ;;  %v1380_v27 = vpop.f32.mrb[77].mxu1 }
 0x2d2   : > { %v1381_v28 = vadd.f32 %v1380_v27, %v3110_v41  ;;  %v1382_v29 = vpop.f32.mrb[78].mxu1  ;;  %1770 = vmatprep.mubr.bf16.mxu0 %v1545_v24 }
 0x2d3   : > { %v1383_v30 = vadd.f32 %v1382_v29, %v3106_v8  ;;  %v1384_v31 = vpop.f32.mrb[79].mxu1  ;;  %1771 = vmatmul.mubr.bf16.gmra.mrb[72].mxu0 %v1544_v23  ;;  %v1471_v35 = vmax.f32 %v1379_v26, 0.0 }
 0x2d4   : > { %v1385_v32 = vadd.f32 %v1384_v31, %v3110_v41  ;;  %v1472_v40 = vmax.f32 %v1381_v28, 0.0 }
 0x2d5   : > { %v1473_v39 = vmax.f32 %v1383_v30, 0.0 }
 0x2d6   : > { %v1474_v42 = vmax.f32 %v1385_v32, 0.0 }
 0x2d7   : > { %v1546_v43 = vpack.c.bf16 %v1473_v39, %v1471_v35  ;;  %v3179_v39 = vld [vmem:[%s3306_s6] ss:$0 sm:$0xff] }
 0x2d8   : > { %v1547_v44 = vpack.c.bf16 %v1474_v42, %v1472_v40  ;;  %v1388_v46 = vpop.f32.mrb[80].mxu1 }
 0x2d9   : > { %v1389_v47 = vadd.f32 %v1388_v46, %v3106_v8  ;;  %v1390_v49 = vpop.f32.mrb[81].mxu1 }
 0x2da   : > { %v1391_v50 = vadd.f32 %v1390_v49, %v3110_v41  ;;  %v1392_v52 = vpop.f32.mrb[82].mxu1  ;;  %1778 = vmatprep.mubr.bf16.mxu0 %v1547_v44 }
 0x2db   : > { %v1393_v54 = vadd.f32 %v1392_v52, %v3106_v8  ;;  %v1394_v55 = vpop.f32.mrb[83].mxu1  ;;  %1779 = vmatmul.mubr.bf16.gmra.mrb[76].mxu0 %v1546_v43  ;;  %v1475_v58 = vmax.f32 %v1389_v47, 0.0 }
 0x2dc   : > { %v1395_v57 = vadd.f32 %v1394_v55, %v3110_v41  ;;  %v1476_v60 = vmax.f32 %v1391_v50, 0.0 }
 0x2dd   : > { %v1477_v59 = vmax.f32 %v1393_v54, 0.0 }
 0x2de   : > { %v1478_v61 = vmax.f32 %v1395_v57, 0.0 }
 0x2df   : > { %v1548_v62 = vpack.c.bf16 %v1477_v59, %v1475_v58 }
 0x2e0   : > { %v1549_v63 = vpack.c.bf16 %v1478_v61, %v1476_v60  ;;  %v1398_v0 = vpop.f32.mrb[84].mxu1 }
 0x2e1   : > { %v1399_v37 = vadd.f32 %v1398_v0, %v3106_v8  ;;  %v1400_v38 = vpop.f32.mrb[85].mxu1 }
 0x2e2   : > { %v1401_v4 = vadd.f32 %v1400_v38, %v3110_v41  ;;  %v1402_v45 = vpop.f32.mrb[86].mxu1  ;;  %1786 = vmatprep.mubr.bf16.mxu0 %v1549_v63 }
 0x2e3   : > { %v1403_v11 = vadd.f32 %v1402_v45, %v3106_v8  ;;  %v1404_v15 = vpop.f32.mrb[87].mxu1  ;;  %1787 = vmatmul.mubr.bf16.gmra.mrb[80].mxu0 %v1548_v62  ;;  %v1479_v51 = vmax.f32 %v1399_v37, 0.0 }
 0x2e4   : > { %v1405_v48 = vadd.f32 %v1404_v15, %v3110_v41  ;;  %v1480_v19 = vmax.f32 %v1401_v4, 0.0 }
 0x2e5   : > { %v1481_v16 = vmax.f32 %v1403_v11, 0.0 }
 0x2e6   : > { %v1482_v53 = vmax.f32 %v1405_v48, 0.0 }
 0x2e7   : > { %v1550_v56 = vpack.c.bf16 %v1481_v16, %v1479_v51 }
 0x2e8   : > { %v1551_v1 = vpack.c.bf16 %v1482_v53, %v1480_v19  ;;  %v1408_v34 = vpop.f32.mrb[88].mxu1 }
 0x2e9   : > { %v1409_v2 = vadd.f32 %v1408_v34, %v3106_v8  ;;  %v1410_v3 = vpop.f32.mrb[89].mxu1 }
 0x2ea   : > { %v1411_v33 = vadd.f32 %v1410_v3, %v3110_v41  ;;  %v1412_v36 = vpop.f32.mrb[90].mxu1  ;;  %1794 = vmatprep.mubr.bf16.mxu0 %v1551_v1 }
 0x2eb   : > { %v1413_v5 = vadd.f32 %v1412_v36, %v3106_v8  ;;  %v1414_v6 = vpop.f32.mrb[91].mxu1  ;;  %1795 = vmatmul.mubr.bf16.gmra.mrb[84].mxu0 %v1550_v56  ;;  %v1483_v9 = vmax.f32 %v1409_v2, 0.0 }
 0x2ec   : > { %v1415_v7 = vadd.f32 %v1414_v6, %v3110_v41  ;;  %v1484_v12 = vmax.f32 %v1411_v33, 0.0 }
 0x2ed   : > { %v1485_v10 = vmax.f32 %v1413_v5, 0.0 }
 0x2ee   : > { %v1486_v13 = vmax.f32 %v1415_v7, 0.0 }
 0x2ef   : > { %v1552_v14 = vpack.c.bf16 %v1485_v10, %v1483_v9 }
 0x2f0   : > { %v1553_v17 = vpack.c.bf16 %v1486_v13, %v1484_v12  ;;  %v1418_v18 = vpop.f32.mrb[92].mxu1 }
 0x2f1   : > { %v1419_v20 = vadd.f32 %v1418_v18, %v3106_v8  ;;  %v1420_v21 = vpop.f32.mrb[93].mxu1 }
 0x2f2   : > { %v1421_v22 = vadd.f32 %v1420_v21, %v3110_v41  ;;  %v1422_v23 = vpop.f32.mrb[94].mxu1  ;;  %1802 = vmatprep.mubr.bf16.mxu0 %v1553_v17 }
 0x2f3   : > { %v1423_v24 = vadd.f32 %v1422_v23, %v3106_v8  ;;  %v1424_v25 = vpop.f32.mrb[95].mxu1  ;;  %1803 = vmatmul.mubr.bf16.gmra.mrb[88].mxu0 %v1552_v14  ;;  %v1487_v27 = vmax.f32 %v1419_v20, 0.0 }
 0x2f4   : > { %v1425_v26 = vadd.f32 %v1424_v25, %v3110_v41  ;;  %v1488_v29 = vmax.f32 %v1421_v22, 0.0 }
 0x2f5   : > { %v1489_v28 = vmax.f32 %v1423_v24, 0.0 }
 0x2f6   : > { %v1490_v30 = vmax.f32 %v1425_v26, 0.0 }
 0x2f7   : > { %v1554_v31 = vpack.c.bf16 %v1489_v28, %v1487_v27 }
 0x2f8   : > { %v1555_v32 = vpack.c.bf16 %v1490_v30, %v1488_v29 }
 0x2fa   : > { %1810 = vmatprep.mubr.bf16.mxu0 %v1555_v32 }
 0x2fb   : > { %1811 = vmatmul.mubr.bf16.gmra.mrb[92].mxu0 %v1554_v31 }
 0x356   : > { %v2120_v35 = vpop.f32.mrb[32].mxu0 }
 0x357   : > { %v2121_v8 = vpop.f32.mrb[33].mxu0 }
 0x358   : > { %v2122_v40 = vadd.f32 %v2121_v8, %v2120_v35  ;;  %v2123_v42 = vpop.f32.mrb[34].mxu0 }
 0x359   : > { %v2124_v43 = vpop.f32.mrb[35].mxu0 }
 0x35a   : > { %v1693_v41 = vadd.f32 %v2122_v40, %v3179_v39  ;;  %v2125_v44 = vadd.f32 %v2124_v43, %v2123_v42 }
 0x35c   : > { %1819 = vst [vmem:[%s3184_s19] sm:$0xff] %v1693_v41  ;;  %v1696_v46 = vadd.f32 %v2125_v44, %v3179_v39 }
 0x35e   : > { %1820 = vst [vmem:[%s3184_s19 + $0x8] sm:$0xff] %v1696_v46  ;;  %v2126_v47 = vpop.f32.mrb[36].mxu0 }
 0x35f   : > { %v2127_v49 = vpop.f32.mrb[37].mxu0 }
 0x360   : > { %v2128_v50 = vadd.f32 %v2127_v49, %v2126_v47  ;;  %v2129_v52 = vpop.f32.mrb[38].mxu0 }
 0x361   : > { %v2130_v54 = vpop.f32.mrb[39].mxu0 }
 0x362   : > { %v1701_v55 = vadd.f32 %v2128_v50, %v3179_v39  ;;  %v2131_v57 = vadd.f32 %v2130_v54, %v2129_v52 }
 0x364   : > { %1821 = vst [vmem:[%s3184_s19 + $0x10] sm:$0xff] %v1701_v55  ;;  %v1704_v58 = vadd.f32 %v2131_v57, %v3179_v39 }
 0x366   : > { %1822 = vst [vmem:[%s3184_s19 + $0x18] sm:$0xff] %v1704_v58  ;;  %v2132_v59 = vpop.f32.mrb[40].mxu0 }
 0x367   : > { %v2133_v60 = vpop.f32.mrb[41].mxu0 }
 0x368   : > { %v2134_v61 = vadd.f32 %v2133_v60, %v2132_v59  ;;  %v2135_v62 = vpop.f32.mrb[42].mxu0 }
 0x369   : > { %v2136_v63 = vpop.f32.mrb[43].mxu0 }
 0x36a   : > { %v1709_v0 = vadd.f32 %v2134_v61, %v3179_v39  ;;  %v2137_v37 = vadd.f32 %v2136_v63, %v2135_v62 }
 0x36c   : > { %1823 = vst [vmem:[%s3184_s19 + $0x20] sm:$0xff] %v1709_v0  ;;  %v1712_v38 = vadd.f32 %v2137_v37, %v3179_v39 }
 0x36e   : > { %1824 = vst [vmem:[%s3184_s19 + $0x28] sm:$0xff] %v1712_v38  ;;  %v2138_v4 = vpop.f32.mrb[44].mxu0 }
 0x36f   : > { %v2139_v45 = vpop.f32.mrb[45].mxu0 }
 0x370   : > { %v2140_v11 = vadd.f32 %v2139_v45, %v2138_v4  ;;  %v2141_v15 = vpop.f32.mrb[46].mxu0 }
 0x371   : > { %v2142_v48 = vpop.f32.mrb[47].mxu0 }
 0x372   : > { %v1717_v51 = vadd.f32 %v2140_v11, %v3179_v39  ;;  %v2143_v16 = vadd.f32 %v2142_v48, %v2141_v15 }
 0x374   : > { %1825 = vst [vmem:[%s3184_s19 + $0x30] sm:$0xff] %v1717_v51  ;;  %v1720_v19 = vadd.f32 %v2143_v16, %v3179_v39 }
 0x376   : > { %1826 = vst [vmem:[%s3184_s19 + $0x38] sm:$0xff] %v1720_v19  ;;  %v2144_v53 = vpop.f32.mrb[48].mxu0 }
 0x377   : > { %v2145_v56 = vpop.f32.mrb[49].mxu0 }
 0x378   : > { %v2146_v1 = vadd.f32 %v2145_v56, %v2144_v53  ;;  %v2147_v34 = vpop.f32.mrb[50].mxu0 }
 0x379   : > { %v2148_v2 = vpop.f32.mrb[51].mxu0 }
 0x37a   : > { %v1725_v3 = vadd.f32 %v2146_v1, %v3179_v39  ;;  %v2149_v33 = vadd.f32 %v2148_v2, %v2147_v34 }
 0x37c   : > { %1827 = vst [vmem:[%s3184_s19 + $0x40] sm:$0xff] %v1725_v3  ;;  %v1728_v36 = vadd.f32 %v2149_v33, %v3179_v39 }
 0x37e   : > { %1828 = vst [vmem:[%s3184_s19 + $0x48] sm:$0xff] %v1728_v36  ;;  %v2150_v5 = vpop.f32.mrb[52].mxu0 }
 0x37f   : > { %v2151_v6 = vpop.f32.mrb[53].mxu0 }
 0x380   : > { %v2152_v7 = vadd.f32 %v2151_v6, %v2150_v5  ;;  %v2153_v9 = vpop.f32.mrb[54].mxu0 }
 0x381   : > { %v2154_v10 = vpop.f32.mrb[55].mxu0 }
 0x382   : > { %v1733_v12 = vadd.f32 %v2152_v7, %v3179_v39  ;;  %v2155_v13 = vadd.f32 %v2154_v10, %v2153_v9 }
 0x384   : > { %1829 = vst [vmem:[%s3184_s19 + $0x50] sm:$0xff] %v1733_v12  ;;  %v1736_v14 = vadd.f32 %v2155_v13, %v3179_v39 }
 0x386   : > { %1830 = vst [vmem:[%s3184_s19 + $0x58] sm:$0xff] %v1736_v14  ;;  %v2156_v17 = vpop.f32.mrb[56].mxu0 }
 0x387   : > { %v2157_v18 = vpop.f32.mrb[57].mxu0 }
 0x388   : > { %v2158_v20 = vadd.f32 %v2157_v18, %v2156_v17  ;;  %v2159_v21 = vpop.f32.mrb[58].mxu0 }
 0x389   : > { %v2160_v22 = vpop.f32.mrb[59].mxu0 }
 0x38a   : > { %v1741_v23 = vadd.f32 %v2158_v20, %v3179_v39  ;;  %v2161_v24 = vadd.f32 %v2160_v22, %v2159_v21 }
 0x38c   : > { %1831 = vst [vmem:[%s3184_s19 + $0x60] sm:$0xff] %v1741_v23  ;;  %v1744_v25 = vadd.f32 %v2161_v24, %v3179_v39 }
 0x38e   : > { %1832 = vst [vmem:[%s3184_s19 + $0x68] sm:$0xff] %v1744_v25  ;;  %v2162_v26 = vpop.f32.mrb[60].mxu0 }
 0x38f   : > { %v2163_v27 = vpop.f32.mrb[61].mxu0 }
 0x390   : > { %v2164_v28 = vadd.f32 %v2163_v27, %v2162_v26  ;;  %v2165_v29 = vpop.f32.mrb[62].mxu0 }
 0x391   : > { %v2166_v30 = vpop.f32.mrb[63].mxu0 }
 0x392   : > { %v1749_v31 = vadd.f32 %v2164_v28, %v3179_v39  ;;  %v2167_v32 = vadd.f32 %v2166_v30, %v2165_v29 }
 0x394   : > { %1833 = vst [vmem:[%s3184_s19 + $0x70] sm:$0xff] %v1749_v31  ;;  %v1752_v35 = vadd.f32 %v2167_v32, %v3179_v39 }
 0x396   : > { %1834 = vst [vmem:[%s3184_s19 + $0x78] sm:$0xff] %v1752_v35  ;;  %v2168_v8 = vpop.f32.mrb[64].mxu0 }
 0x397   : > { %v2169_v40 = vpop.f32.mrb[65].mxu0 }
 0x398   : > { %v2170_v42 = vadd.f32 %v2169_v40, %v2168_v8  ;;  %v2171_v43 = vpop.f32.mrb[66].mxu0 }
 0x399   : > { %v2172_v41 = vpop.f32.mrb[67].mxu0 }
 0x39a   : > { %v1757_v44 = vadd.f32 %v2170_v42, %v3179_v39  ;;  %v2173_v46 = vadd.f32 %v2172_v41, %v2171_v43 }
 0x39c   : > { %1835 = vst [vmem:[%s3184_s19 + $0x80] sm:$0xff] %v1757_v44  ;;  %v1760_v47 = vadd.f32 %v2173_v46, %v3179_v39 }
 0x39e   : > { %1836 = vst [vmem:[%s3184_s19 + $0x88] sm:$0xff] %v1760_v47  ;;  %v2174_v49 = vpop.f32.mrb[68].mxu0 }
 0x39f   : > { %v2175_v50 = vpop.f32.mrb[69].mxu0 }
 0x3a0   : > { %v2176_v52 = vadd.f32 %v2175_v50, %v2174_v49  ;;  %v2177_v54 = vpop.f32.mrb[70].mxu0 }
 0x3a1   : > { %v2178_v55 = vpop.f32.mrb[71].mxu0 }
 0x3a2   : > { %v1765_v57 = vadd.f32 %v2176_v52, %v3179_v39  ;;  %v2179_v58 = vadd.f32 %v2178_v55, %v2177_v54 }
 0x3a4   : > { %1837 = vst [vmem:[%s3184_s19 + $0x90] sm:$0xff] %v1765_v57  ;;  %v1768_v59 = vadd.f32 %v2179_v58, %v3179_v39 }
 0x3a6   : > { %1838 = vst [vmem:[%s3184_s19 + $0x98] sm:$0xff] %v1768_v59  ;;  %v2180_v60 = vpop.f32.mrb[72].mxu0 }
 0x3a7   : > { %v2181_v61 = vpop.f32.mrb[73].mxu0 }
 0x3a8   : > { %v2182_v62 = vadd.f32 %v2181_v61, %v2180_v60  ;;  %v2183_v63 = vpop.f32.mrb[74].mxu0 }
 0x3a9   : > { %v2184_v0 = vpop.f32.mrb[75].mxu0 }
 0x3aa   : > { %v1773_v37 = vadd.f32 %v2182_v62, %v3179_v39  ;;  %v2185_v38 = vadd.f32 %v2184_v0, %v2183_v63 }
 0x3ac   : > { %1839 = vst [vmem:[%s3184_s19 + $0xa0] sm:$0xff] %v1773_v37  ;;  %v1776_v4 = vadd.f32 %v2185_v38, %v3179_v39 }
 0x3ae   : > { %1840 = vst [vmem:[%s3184_s19 + $0xa8] sm:$0xff] %v1776_v4  ;;  %v2186_v45 = vpop.f32.mrb[76].mxu0 }
 0x3af   : > { %v2187_v11 = vpop.f32.mrb[77].mxu0 }
 0x3b0   : > { %v2188_v15 = vadd.f32 %v2187_v11, %v2186_v45  ;;  %v2189_v48 = vpop.f32.mrb[78].mxu0 }
 0x3b1   : > { %v2190_v51 = vpop.f32.mrb[79].mxu0 }
 0x3b2   : > { %v1781_v16 = vadd.f32 %v2188_v15, %v3179_v39  ;;  %v2191_v19 = vadd.f32 %v2190_v51, %v2189_v48 }
 0x3b4   : > { %1841 = vst [vmem:[%s3184_s19 + $0xb0] sm:$0xff] %v1781_v16  ;;  %v1784_v53 = vadd.f32 %v2191_v19, %v3179_v39 }
 0x3b6   : > { %1842 = vst [vmem:[%s3184_s19 + $0xb8] sm:$0xff] %v1784_v53  ;;  %v2192_v56 = vpop.f32.mrb[80].mxu0 }
 0x3b7   : > { %v2193_v1 = vpop.f32.mrb[81].mxu0 }
 0x3b8   : > { %v2194_v34 = vadd.f32 %v2193_v1, %v2192_v56  ;;  %v2195_v2 = vpop.f32.mrb[82].mxu0 }
 0x3b9   : > { %v2196_v3 = vpop.f32.mrb[83].mxu0 }
 0x3ba   : > { %v1789_v33 = vadd.f32 %v2194_v34, %v3179_v39  ;;  %v2197_v36 = vadd.f32 %v2196_v3, %v2195_v2 }
 0x3bc   : > { %1843 = vst [vmem:[%s3184_s19 + $0xc0] sm:$0xff] %v1789_v33  ;;  %v1792_v5 = vadd.f32 %v2197_v36, %v3179_v39 }
 0x3be   : > { %1844 = vst [vmem:[%s3184_s19 + $0xc8] sm:$0xff] %v1792_v5  ;;  %v2198_v6 = vpop.f32.mrb[84].mxu0 }
 0x3bf   : > { %v2199_v7 = vpop.f32.mrb[85].mxu0 }
 0x3c0   : > { %v2200_v9 = vadd.f32 %v2199_v7, %v2198_v6  ;;  %v2201_v10 = vpop.f32.mrb[86].mxu0 }
 0x3c1   : > { %v2202_v12 = vpop.f32.mrb[87].mxu0 }
 0x3c2   : > { %v1797_v13 = vadd.f32 %v2200_v9, %v3179_v39  ;;  %v2203_v14 = vadd.f32 %v2202_v12, %v2201_v10 }
 0x3c4   : > { %1845 = vst [vmem:[%s3184_s19 + $0xd0] sm:$0xff] %v1797_v13  ;;  %v1800_v17 = vadd.f32 %v2203_v14, %v3179_v39 }
 0x3c6   : > { %1846 = vst [vmem:[%s3184_s19 + $0xd8] sm:$0xff] %v1800_v17  ;;  %v2204_v18 = vpop.f32.mrb[88].mxu0 }
 0x3c7   : > { %v2205_v20 = vpop.f32.mrb[89].mxu0 }
 0x3c8   : > { %v2206_v21 = vadd.f32 %v2205_v20, %v2204_v18  ;;  %v2207_v22 = vpop.f32.mrb[90].mxu0 }
 0x3c9   : > { %v2208_v23 = vpop.f32.mrb[91].mxu0 }
 0x3ca   : > { %v1805_v24 = vadd.f32 %v2206_v21, %v3179_v39  ;;  %v2209_v25 = vadd.f32 %v2208_v23, %v2207_v22 }
 0x3cc   : > { %1847 = vst [vmem:[%s3184_s19 + $0xe0] sm:$0xff] %v1805_v24  ;;  %v1808_v26 = vadd.f32 %v2209_v25, %v3179_v39 }
 0x3ce   : > { %1848 = vst [vmem:[%s3184_s19 + $0xe8] sm:$0xff] %v1808_v26  ;;  %v2210_v27 = vpop.f32.mrb[92].mxu0 }
 0x3cf   : > { %v2211_v28 = vpop.f32.mrb[93].mxu0 }
 0x3d0   : > { %v2212_v29 = vadd.f32 %v2211_v28, %v2210_v27  ;;  %v2213_v30 = vpop.f32.mrb[94].mxu0 }
 0x3d1   : > { %v2214_v31 = vpop.f32.mrb[95].mxu0 }
 0x3d2   : > { %v1813_v32 = vadd.f32 %v2212_v29, %v3179_v39  ;;  %v2215_v35 = vadd.f32 %v2214_v31, %v2213_v30 }
 0x3d4   : > { %1849 = vst [vmem:[%s3184_s19 + $0xf0] sm:$0xff] %v1813_v32  ;;  %v1816_v8 = vadd.f32 %v2215_v35, %v3179_v39 }
 0x3d6   : > { %1850 = vst [vmem:[%s3184_s19 + $0xf8] sm:$0xff] %v1816_v8 }
 0x3d7   : > { %2618 = shalt.err (!%p2615_p4)
}
 0x3d8   : > { %s2619_s13 = scalar_lea.hbm %s3251_s10, 4096  ;;  %s2623_s8 = scalar_lea.hbm %s3307_s7, 8192 }
 0x3d9   : > { %p2620_p9 = scmp.ne.s32.totalorder %s3251_s10, %s2619_s13  ;;  %p2624_p8 = scmp.lt.u32.totalorder %s3251_s10, %s3307_s7 }
 0x3da   : > { %p2625_p13 = scmp.lt.u32.totalorder %s2623_s8, %s2619_s13  ;;  %p2627_p10 = scmp.lt.u32.totalorder %s2619_s13, %s3251_s10 }
 0x3db   : > { %p2621_p0 = pnand %p2620_p9, %p2883_p5 }
 0x3dc   : > { %p2626_p6 = por %p2625_p13, %p2624_p8 }
 0x3dd   : > { %p2622_p11 = pneg %p2621_p0 }
 0x3de   : > { %p2628_p3 = por %p2627_p10, %p2626_p6 }
 0x3e0   : > { %p2629_p7 = pnand %p2628_p3, %p2622_p11 }
 0x3e2   : > { %2632 = shalt.err (!%p2629_p7)
}
 0x3e3   : > { %s2690_s16 = smov 128   ;;  %s2691_s11 = smov 8  }
 0x3e4   : > { %2262 = dma.vmem_to_hbm [thread:$0]  (%p2883_p5), %s3253_s29, 4096, %s3251_s10, %s1852_s28, %s2690_s16, %s2690_s16, %s2691_s11  }
 0x3e5 PF: > { %s3327_s22 = sld [smem:[#allocation15_spill]]  ;;  %s1880_s17 = sand.u32 1, %s2667_s24  }
 0x3e6   : > { %p3329_p1 = scmp.ge.s32.totalorder %s2679_s27, 2  ;;  %s1881_s30 = scalar_lea.sflag [#allocation4], %s1880_s17 }
 0x3eb   : > { %p3328_p12 = scmp.ne.s32.totalorder %s3327_s22, 0 }
 0x3ed   : > { %p2279_p2 = pnand %p3329_p1, %p3328_p12 }
 0x3ef   : > { %2662 = dma.done.wait (!%p2279_p2), %s1881_s30, 4096  }
 0x3f0   : > { %2664 = vsyncadd (!%p2279_p2), %s1881_s30, 4294963200  ;;  %p22_p4 = scmp.ge.s32.totalorder %s2869_s18, 4   ;;  %s3330_s24 = smov %s2671_s25 }
 0x3f1   : > { %s3331_s25 = smov %s2675_s26  ;;  %s3332_s26 = smov %s2879_s21 }
 0x3f2   : > { %s3333_s27 = smov %s2869_s18  ;;  %24 = sbr.rel (!%p22_p4) target bundleno = 7 (0x7), region = 105 }
 0x3f9   :  { %1886 = vsyncpa [#allocation3], 1 }
 0x3fa   :  { %1888 = vsyncpa [#allocation3 + $0x1], 1 }
 0x3fb   :  { %1889 = vsyncpa [#allocation6], 1 }
 0x3fc   :  { %1890 = vsyncpa [#allocation9], 1 }
 0x3fd   :  { %1891 = vsyncpa [#allocation4], 1 }
 0x3fe   :  { %1893 = vsyncpa [#allocation4 + $0x1], 1 }

</bundles_post_ra>
